<compile_context>
chip_gen: v7x
topology: tpu7x:2x2x1
jax: 0.10.0
libtpu: 0.0.40
codegen_flags: <defaults>
</compile_context>

<pallas_src>
from functools import partial

import jax
import jax.numpy as jnp
from jax.experimental import pallas as pl
from jax.experimental.pallas import tpu as pltpu


# ----------------------------------------------------------------------------
# Hardware heuristics (trace-time only; correctness never depends on them)
# ----------------------------------------------------------------------------
def _tensorcores_per_chip():
    """2 TensorCores on megacore / dual-TC chips (v4, v5p, v7x); else 1."""
    try:
        kind = jax.devices()[0].device_kind.lower()
    except Exception:
        return 1
    if any(tag in kind for tag in ("v7", "v4", "v5p")):
        return 2
    return 1


# ----------------------------------------------------------------------------
# Linear head:  out = source @ W + b    with W stored as (K, n_pad), bf16
# ----------------------------------------------------------------------------
def _fused_linear_kernel(x_ref, w_ref, b_ref, o_ref):
    """One N-tile of the output; full K resident (no reduction grid).

    x_ref: (M, K)    f32 activations (resident across the grid)
    w_ref: (K, tn)   bf16 weight tile, MXU-native (K, N) layout
    b_ref: (1, tn)   f32 bias tile
    o_ref: (M, tn)   f32 output tile
    """
    # Upcast only the weight tile (activations stay f32 -> f32-level logits).
    w = w_ref[...].astype(jnp.float32)
    acc = jnp.dot(x_ref[...], w, preferred_element_type=jnp.float32)
    o_ref[...] = (acc + b_ref[...]).astype(o_ref.dtype)


def _pick_tile_n(n_pad, n_cores):
    """Lane-aligned N tile.  Cap at 512 so the in-kernel f32 upcast of the
    (2048, tn) tile stays <= 4 MiB (safe inside v5e's 16 MiB scoped default
    together with the double-buffered bf16 stream)."""
    cap = 512
    if n_pad <= cap:
        return n_pad                       # single tile, grid=1
    half = n_pad // 2
    if n_cores >= 2 and half % 128 == 0 and half <= cap:
        return half                        # one weight half per TensorCore
    for tn in (512, 256, 128):
        if n_pad % tn == 0:
            return tn
    return 128                             # unreachable: n_pad is a 128-multiple


@partial(jax.jit, static_argnames=("num_classes",))
def classifier_forward(source, weight_kn, bias, num_classes=None):
    """source: (M, 2048) f32; weight_kn: (2048, n_pad) bf16 (pre-transposed and
    pre-padded at init); bias: (n_pad,) f32 (zero in padded columns).
    Returns (fc1(source)[:, :num_classes], source)."""
    M, K = source.shape
    K2, n_pad = weight_kn.shape
    assert K == K2, "feature dim mismatch"
    assert n_pad % 128 == 0, "weight must be padded to a lane multiple at init"

    tn = _pick_tile_n(n_pad, _tensorcores_per_chip())
    b2d = bias.reshape(1, n_pad)

    out = pl.pallas_call(
        _fused_linear_kernel,
        out_shape=jax.ShapeDtypeStruct((M, n_pad), source.dtype),
        grid_spec=pltpu.PrefetchScalarGridSpec(
            num_scalar_prefetch=0,
            grid=(n_pad // tn,),                          # independent N tiles only
            in_specs=[
                pl.BlockSpec((M, K), lambda j: (0, 0)),   # x resident, full K
                pl.BlockSpec((K, tn), lambda j: (0, j)),  # streamed (K, N) weight tile
                pl.BlockSpec((1, tn), lambda j: (0, j)),  # bias tile
            ],
            out_specs=pl.BlockSpec((M, tn), lambda j: (0, j)),
        ),
        compiler_params=pltpu.CompilerParams(
            # Output-column tiles are independent -> shard across TCs.
            dimension_semantics=("parallel",),
        ),
    )(source, weight_kn, b2d)

    if num_classes is not None and num_classes != n_pad:
        out = out[:, :num_classes]

    # TODO(synk): add an M grid axis (tm=256-512, 'parallel') if callers stack
    # many feature batches; at M~8 the resident-x spec is the right choice.
    tmp_mmd = source  # forward returns the untouched input as second element
    return out, tmp_mmd


def init_classifier_params(key, num_classes=1000, in_features=2048,
                           weight_dtype=jnp.bfloat16):
    """Mirror the module __init__: weight ~ N(0, 0.005); bias ~ U(-1/sqrt(K), 1/sqrt(K)).

    The weight is stored ONCE in the layout the kernel wants:
      * transposed to MXU-native (K, N),
      * N padded to a multiple of 128 (padded columns: zero weight AND zero bias,
        sliced off after the call),
      * bf16 (the kernel upcasts to f32; HBM weight stream is halved)."""
    n_pad = ((num_classes + 127) // 128) * 128
    kw, kb = jax.random.split(key)
    w = 0.005 * jax.random.normal(kw, (num_classes, in_features), jnp.float32)
    bound = 1.0 / (in_features ** 0.5)
    b = jax.random.uniform(kb, (num_classes,), jnp.float32, -bound, bound)

    w_kn = jnp.zeros((in_features, n_pad), weight_dtype)
    w_kn = w_kn.at[:, :num_classes].set(w.T.astype(weight_dtype))
    b_pad = jnp.zeros((n_pad,), jnp.float32).at[:num_classes].set(b)
    return w_kn, b_pad


# ----------------------------------------------------------------------------
# ResNet.forward head:  (adaptive_avg_pool2d(x, 1).squeeze(), x)
# ----------------------------------------------------------------------------
def _global_avg_pool_kernel(x_ref, o_ref):
    # x_ref: (rows_block, H*W) — lane-axis mean over the spatial width.
    o_ref[...] = jnp.mean(x_ref[...], axis=1, keepdims=True).astype(o_ref.dtype)


def _pick_pool_rows(rows):
    """Largest 8-aligned row block <= 2048 that divides rows (else full block)."""
    for br in (2048, 1024, 512, 256, 128, 64, 32, 16, 8):
        if rows % br == 0:
            return br
    return rows  # full-extent block is always legal


@jax.jit
def resnet_head_forward(feature_map):
    """feature_map: (B, C, H, W) output of the resnet50 backbone.
    Returns (global_avg_pool(x) of shape (B, C), feature_map)."""
    B, C, H, W = feature_map.shape
    rows, hw = B * C, H * W
    flat = feature_map.reshape(rows, hw)   # contiguous reshape: no data movement

    block_rows = _pick_pool_rows(rows)
    pooled = pl.pallas_call(
        _global_avg_pool_kernel,
        out_shape=jax.ShapeDtypeStruct((rows, 1), feature_map.dtype),
        grid_spec=pltpu.PrefetchScalarGridSpec(
            num_scalar_prefetch=0,
            grid=(rows // block_rows,),
            in_specs=[pl.BlockSpec((block_rows, hw), lambda i: (i, 0))],
            out_specs=pl.BlockSpec((block_rows, 1), lambda i: (i, 0)),
        ),
        compiler_params=pltpu.CompilerParams(
            dimension_semantics=("parallel",),   # row blocks are independent
        ),
    )(flat)
    return pooled.reshape(B, C), feature_map


# ----------------------------------------------------------------------------
if __name__ == "__main__":
    key = jax.random.PRNGKey(0)
    k_x, k_p, k_f = jax.random.split(key, 3)

    # --- ResNet forward head (global avg-pool over a backbone feature map) --
    B, C, H, W = 2, 2048, 7, 7
    feat = jax.random.normal(k_f, (B, C, H, W), jnp.float32)
    pooled, feature = resnet_head_forward(feat)
    jax.block_until_ready((pooled, feature))

    ref_pool = feat.mean(axis=(2, 3))
    assert pooled.shape == (B, C)
    assert jnp.allclose(pooled, ref_pool, atol=1e-4, rtol=1e-4), \
        float(jnp.max(jnp.abs(pooled - ref_pool)))
    assert jnp.array_equal(feature, feat)

    # --- classifier head (in_features hard-coded to 2048 by nn.Linear) ------
    batch = 8
    in_features = 2048
    num_classes = 200          # not lane-aligned: exercises pad-at-init + slice

    source = jax.random.normal(k_x, (batch, in_features), jnp.float32)
    weight_kn, bias_p = init_classifier_params(k_p, num_classes, in_features)

    logits, tmp_mmd = classifier_forward(source, weight_kn, bias_p,
                                         num_classes=num_classes)
    jax.block_until_ready((logits, tmp_mmd))

    ref = source @ weight_kn[:, :num_classes].astype(jnp.float32) \
        + bias_p[:num_classes]
    assert logits.shape == (batch, num_classes)
    assert jnp.allclose(logits, ref, atol=5e-3, rtol=5e-3), \
        float(jnp.max(jnp.abs(logits - ref)))
    assert jnp.array_equal(tmp_mmd, source)

    print("KERNEL_OK")
</pallas_src>

<mosaic_0001>
module attributes {stable_mosaic.version = 11 : i64} {
  func.func @_global_avg_pool_kernel(%arg0: i32, %arg1: memref<2048x49xf32, #tpu.memory_space<vmem>>, %arg2: memref<2048x1xf32, #tpu.memory_space<vmem>>) attributes {dimension_semantics = [#tpu.dimension_semantics<parallel>], iteration_bounds = array<i64: 2>, scalar_prefetch = 0 : i64, scratch_operands = 0 : i64, tpu.core_type = #tpu.core_type<tc>, window_params = [{transform_indices = @transform_0, window_bounds = array<i64: 2048, 49>}, {transform_indices = @transform_1, window_bounds = array<i64: 2048, 1>}]} {
    %c0 = arith.constant 0 : index
    %c0_0 = arith.constant 0 : index
    %0 = vector.load %arg1[%c0, %c0_0] : memref<2048x49xf32, #tpu.memory_space<vmem>>, vector<2048x49xf32>
    %cst = arith.constant dense<0.000000e+00> : vector<2048xf32>
    %1 = vector.multi_reduction <add>, %0, %cst [1] : vector<2048x49xf32> to vector<2048xf32>
    %2 = vector.shape_cast %1 : vector<2048xf32> to vector<2048x1xf32>
    %cst_1 = arith.constant 4.900000e+01 : f32
    %3 = vector.broadcast %cst_1 : f32 to vector<2048x1xf32>
    %4 = arith.divf %2, %3 : vector<2048x1xf32>
    %c0_2 = arith.constant 0 : index
    %c0_3 = arith.constant 0 : index
    %5 = vector.load %arg2[%c0_2, %c0_3] : memref<2048x1xf32, #tpu.memory_space<vmem>>, vector<2048x1xf32>
    tpu.vector_store %arg2[%c0_2, %c0_3], %4 {strides = array<i32>} : memref<2048x1xf32, #tpu.memory_space<vmem>>, vector<2048x1xf32>,
    return
  }
  func.func @transform_0(%arg0: i32) -> (i32, i32) {
    %c0_i32 = arith.constant 0 : i32
    %c0_i32_0 = arith.constant 0 : i32
    return %arg0, %c0_i32 : i32, i32
  }
  func.func @transform_1(%arg0: i32) -> (i32, i32) {
    %c0_i32 = arith.constant 0 : i32
    %c0_i32_0 = arith.constant 0 : i32
    return %arg0, %c0_i32 : i32, i32
  }
}

</mosaic_0001>

<bundles_post_ra>
// kernel: resnet_head_forward.1
= control target key start
LH: loop header
LB: loop body
LE: loop exit
PB: predicated region body
PF: predicated region fallthrough
CT: control target
= control target key end

     0   :  { %s1752_s6 = smov 0   ;;  %s2804_s0 = inlined_call_operand.vmem [shape: f32[4096,49], index: 0, kind: input, shape index: {}]   ;;  %s2805_s1 = inlined_call_operand.vmem [shape: f32[4096,1], index: 1, kind: output, shape index: {}]  }
   0x1 LB: > { %s1715_s7 = sadd.s32 4294967295, %s1740_s6   ;;  %p1719_p0 = scmp.ge.s32.totalorder %s1740_s6, 1  ;;  %s1740_s6 = sphi %s1752_s6, %s11_s6  }
   0x2   : > { %p88_p1 = scmp.lt.s32.totalorder %s1740_s6, 3 }
   0x4   : > { %p89_p2 = pnand %p1719_p0, %p88_p1 }
   0x5   : > { %s1720_s8 = sshll.u32 (!%p89_p2), %s1715_s7, 8  ;;  %vm376_vm0 = vcmask (!%p89_p2), 400384   ;;  %vm1402_vm1 = vcmask (!%p89_p2), 7168  }
   0x6   : > { %92 = sbr.rel (%p89_p2) target bundleno = 671 (0x29f), region = 24  ;;  %p109_p3 = scmp.lt.s32.totalorder (!%p89_p2), %s1720_s8, 511 }
   0xd   : > { %s2807_s8 = smov (!%p109_p3, %s1720_s8), 511 }
   0xe   : > { %s1721_s9 = sshll.u32 %s2807_s8, 3 }
   0xf   : > { %s1768_s12 = scalar_lea.vmem %s2804_s0, %s1721_s9  ;;  %s1921_s15 = scalar_lea.vmem %s2805_s1, %s1721_s9 }
  0x10   : > { %v122_v0 = vld [vmem:[%s1768_s12 + $0x10] sm:$0xff]  ;;  %v120_v1 = vld [vmem:[%s1768_s12] sm:$0xff]  ;;  %v123_v2 = vld [vmem:[%s1768_s12 + $0x18] sm:$0xff] }
  0x11   : > { %v383_v3 = vsel %vm376_vm0, %v122_v0, 0.0  ;;  %v377_v4 = vsel %vm376_vm0, %v120_v1, 0.0  ;;  %v121_v5 = vld [vmem:[%s1768_s12 + $0x8] sm:$0xff]  ;;  %v386_v6 = vsel %vm376_vm0, %v123_v2, 0.0  ;;  %v124_v9 = vld [vmem:[%s1768_s12 + $0x20] sm:$0xff]  ;;  %v127_v12 = vld [vmem:[%s1768_s12 + $0x38] sm:$0xff] }
  0x12   : > { %384 = vadd.xlane.f32.xlu1 %v383_v3  ;;  %378 = vadd.xlane.f32.xlu0 %v377_v4  ;;  %v380_v7 = vsel %vm376_vm0, %v121_v5, 0.0  ;;  %v125_v8 = vld [vmem:[%s1768_s12 + $0x28] sm:$0xff]  ;;  %v389_v11 = vsel %vm376_vm0, %v124_v9, 0.0  ;;  %v126_v13 = vld [vmem:[%s1768_s12 + $0x30] sm:$0xff]  ;;  %v398_v14 = vsel %vm376_vm0, %v127_v12, 0.0  ;;  %v128_v17 = vld [vmem:[%s1768_s12 + $0x40] sm:$0xff] }
  0x13   : > { %v392_v10 = vsel %vm376_vm0, %v125_v8, 0.0  ;;  %v395_v15 = vsel %vm376_vm0, %v126_v13, 0.0  ;;  %v129_v16 = vld [vmem:[%s1768_s12 + $0x48] sm:$0xff]  ;;  %v401_v19 = vsel %vm376_vm0, %v128_v17, 0.0  ;;  %v131_v20 = vld [vmem:[%s1768_s12 + $0x58] sm:$0xff]  ;;  %v130_v21 = vld [vmem:[%s1768_s12 + $0x50] sm:$0xff] }
  0x14   : > { %v404_v18 = vsel %vm376_vm0, %v129_v16, 0.0  ;;  %v410_v22 = vsel %vm376_vm0, %v131_v20, 0.0  ;;  %v407_v23 = vsel %vm376_vm0, %v130_v21, 0.0  ;;  %v133_v24 = vld [vmem:[%s1768_s12 + $0x68] sm:$0xff]  ;;  %v132_v25 = vld [vmem:[%s1768_s12 + $0x60] sm:$0xff]  ;;  %v135_v28 = vld [vmem:[%s1768_s12 + $0x78] sm:$0xff] }
  0x15   : > { %v416_v26 = vsel %vm376_vm0, %v133_v24, 0.0  ;;  %v413_v27 = vsel %vm376_vm0, %v132_v25, 0.0  ;;  %v134_v29 = vld [vmem:[%s1768_s12 + $0x70] sm:$0xff]  ;;  %v422_v30 = vsel %vm376_vm0, %v135_v28, 0.0  ;;  %v137_v32 = vld [vmem:[%s1768_s12 + $0x88] sm:$0xff]  ;;  %v136_v33 = vld [vmem:[%s1768_s12 + $0x80] sm:$0xff] }
  0x16   : > { %387 = vadd.xlane.f32.xlu1 %v386_v6  ;;  %381 = vadd.xlane.f32.xlu0 %v380_v7  ;;  %v419_v31 = vsel %vm376_vm0, %v134_v29, 0.0  ;;  %v428_v34 = vsel %vm376_vm0, %v137_v32, 0.0  ;;  %v425_v35 = vsel %vm376_vm0, %v136_v33, 0.0  ;;  %v139_v36 = vld [vmem:[%s1768_s12 + $0x98] sm:$0xff]  ;;  %v138_v37 = vld [vmem:[%s1768_s12 + $0x90] sm:$0xff]  ;;  %v141_v40 = vld [vmem:[%s1768_s12 + $0xa8] sm:$0xff] }
  0x17   : > { %v434_v38 = vsel %vm376_vm0, %v139_v36, 0.0  ;;  %v431_v39 = vsel %vm376_vm0, %v138_v37, 0.0  ;;  %v140_v41 = vld [vmem:[%s1768_s12 + $0xa0] sm:$0xff]  ;;  %v440_v42 = vsel %vm376_vm0, %v141_v40, 0.0  ;;  %v143_v44 = vld [vmem:[%s1768_s12 + $0xb8] sm:$0xff]  ;;  %v142_v45 = vld [vmem:[%s1768_s12 + $0xb0] sm:$0xff] }
  0x18   : > { %v437_v43 = vsel %vm376_vm0, %v140_v41, 0.0  ;;  %v446_v46 = vsel %vm376_vm0, %v143_v44, 0.0  ;;  %v443_v47 = vsel %vm376_vm0, %v142_v45, 0.0  ;;  %v145_v48 = vld [vmem:[%s1768_s12 + $0xc8] sm:$0xff]  ;;  %v144_v49 = vld [vmem:[%s1768_s12 + $0xc0] sm:$0xff]  ;;  %v147_v52 = vld [vmem:[%s1768_s12 + $0xd8] sm:$0xff] }
  0x19   : > { %v452_v50 = vsel %vm376_vm0, %v145_v48, 0.0  ;;  %v449_v51 = vsel %vm376_vm0, %v144_v49, 0.0  ;;  %v146_v53 = vld [vmem:[%s1768_s12 + $0xd0] sm:$0xff]  ;;  %v458_v54 = vsel %vm376_vm0, %v147_v52, 0.0  ;;  %v149_v56 = vld [vmem:[%s1768_s12 + $0xe8] sm:$0xff]  ;;  %v148_v57 = vld [vmem:[%s1768_s12 + $0xe0] sm:$0xff] }
  0x1a   : > { %393 = vadd.xlane.f32.xlu1 %v392_v10  ;;  %390 = vadd.xlane.f32.xlu0 %v389_v11  ;;  %v455_v55 = vsel %vm376_vm0, %v146_v53, 0.0  ;;  %v464_v58 = vsel %vm376_vm0, %v149_v56, 0.0  ;;  %v461_v59 = vsel %vm376_vm0, %v148_v57, 0.0  ;;  %v151_v60 = vld [vmem:[%s1768_s12 + $0xf8] sm:$0xff]  ;;  %v150_v61 = vld [vmem:[%s1768_s12 + $0xf0] sm:$0xff]  ;;  %v153_v0 = vld [vmem:[%s1768_s12 + $0x108] sm:$0xff] }
  0x1b   : > { %v470_v62 = vsel %vm376_vm0, %v151_v60, 0.0  ;;  %v467_v63 = vsel %vm376_vm0, %v150_v61, 0.0  ;;  %v152_v1 = vld [vmem:[%s1768_s12 + $0x100] sm:$0xff]  ;;  %v476_v2 = vsel %vm376_vm0, %v153_v0, 0.0  ;;  %v155_v4 = vld [vmem:[%s1768_s12 + $0x118] sm:$0xff]  ;;  %v154_v5 = vld [vmem:[%s1768_s12 + $0x110] sm:$0xff] }
  0x1c   : > { %v473_v3 = vsel %vm376_vm0, %v152_v1, 0.0  ;;  %v482_v6 = vsel %vm376_vm0, %v155_v4, 0.0  ;;  %v479_v7 = vsel %vm376_vm0, %v154_v5, 0.0  ;;  %v157_v8 = vld [vmem:[%s1768_s12 + $0x128] sm:$0xff]  ;;  %v156_v9 = vld [vmem:[%s1768_s12 + $0x120] sm:$0xff]  ;;  %v159_v12 = vld [vmem:[%s1768_s12 + $0x138] sm:$0xff] }
  0x1d   : > { %v488_v10 = vsel %vm376_vm0, %v157_v8, 0.0  ;;  %v485_v11 = vsel %vm376_vm0, %v156_v9, 0.0  ;;  %v158_v13 = vld [vmem:[%s1768_s12 + $0x130] sm:$0xff]  ;;  %v161_v16 = vld [vmem:[%s1768_s12 + $0x148] sm:$0xff]  ;;  %v160_v17 = vld [vmem:[%s1768_s12 + $0x140] sm:$0xff] }
  0x1e   : > { %399 = vadd.xlane.f32.xlu1 %v398_v14  ;;  %396 = vadd.xlane.f32.xlu0 %v395_v15  ;;  %v494_v14 = vsel %vm376_vm0, %v159_v12, 0.0  ;;  %v491_v15 = vsel %vm376_vm0, %v158_v13, 0.0  ;;  %v163_v20 = vld [vmem:[%s1768_s12 + $0x158] sm:$0xff]  ;;  %v162_v21 = vld [vmem:[%s1768_s12 + $0x150] sm:$0xff]  ;;  %v165_v24 = vld [vmem:[%s1768_s12 + $0x168] sm:$0xff] }
  0x1f   : > { %v164_v25 = vld [vmem:[%s1768_s12 + $0x160] sm:$0xff]  ;;  %v167_v28 = vld [vmem:[%s1768_s12 + $0x178] sm:$0xff]  ;;  %v166_v29 = vld [vmem:[%s1768_s12 + $0x170] sm:$0xff] }
  0x20   : > { %v169_v32 = vld [vmem:[%s1768_s12 + $0x188] sm:$0xff]  ;;  %v168_v33 = vld [vmem:[%s1768_s12 + $0x180] sm:$0xff]  ;;  %v171_v36 = vld [vmem:[%s1768_s12 + $0x198] sm:$0xff] }
  0x21   : > { %v170_v37 = vld [vmem:[%s1768_s12 + $0x190] sm:$0xff]  ;;  %v173_v40 = vld [vmem:[%s1768_s12 + $0x1a8] sm:$0xff]  ;;  %v172_v41 = vld [vmem:[%s1768_s12 + $0x1a0] sm:$0xff] }
  0x22   : > { %405 = vadd.xlane.f32.xlu1 %v404_v18  ;;  %402 = vadd.xlane.f32.xlu0 %v401_v19  ;;  %v500_v18 = vsel %vm376_vm0, %v161_v16, 0.0  ;;  %v497_v19 = vsel %vm376_vm0, %v160_v17, 0.0  ;;  %v175_v44 = vld [vmem:[%s1768_s12 + $0x1b8] sm:$0xff]  ;;  %v174_v45 = vld [vmem:[%s1768_s12 + $0x1b0] sm:$0xff]  ;;  %v177_v48 = vld [vmem:[%s1768_s12 + $0x1c8] sm:$0xff] }
  0x23   : > { %v176_v49 = vld [vmem:[%s1768_s12 + $0x1c0] sm:$0xff]  ;;  %v179_v52 = vld [vmem:[%s1768_s12 + $0x1d8] sm:$0xff]  ;;  %v178_v53 = vld [vmem:[%s1768_s12 + $0x1d0] sm:$0xff] }
  0x24   : > { %v181_v56 = vld [vmem:[%s1768_s12 + $0x1e8] sm:$0xff]  ;;  %v180_v57 = vld [vmem:[%s1768_s12 + $0x1e0] sm:$0xff]  ;;  %v183_v60 = vld [vmem:[%s1768_s12 + $0x1f8] sm:$0xff] }
  0x25   : > { %v182_v61 = vld [vmem:[%s1768_s12 + $0x1f0] sm:$0xff]  ;;  %v185_v0 = vld [vmem:[%s1768_s12 + $0x208] sm:$0xff]  ;;  %v184_v1 = vld [vmem:[%s1768_s12 + $0x200] sm:$0xff] }
  0x26   : > { %411 = vadd.xlane.f32.xlu1 %v410_v22  ;;  %408 = vadd.xlane.f32.xlu0 %v407_v23  ;;  %v506_v22 = vsel %vm376_vm0, %v163_v20, 0.0  ;;  %v503_v23 = vsel %vm376_vm0, %v162_v21, 0.0  ;;  %v187_v4 = vld [vmem:[%s1768_s12 + $0x218] sm:$0xff]  ;;  %v186_v5 = vld [vmem:[%s1768_s12 + $0x210] sm:$0xff]  ;;  %v189_v8 = vld [vmem:[%s1768_s12 + $0x228] sm:$0xff] }
  0x27   : > { %v188_v9 = vld [vmem:[%s1768_s12 + $0x220] sm:$0xff]  ;;  %v191_v12 = vld [vmem:[%s1768_s12 + $0x238] sm:$0xff]  ;;  %v190_v13 = vld [vmem:[%s1768_s12 + $0x230] sm:$0xff] }
  0x28   : > { %v193_v16 = vld [vmem:[%s1768_s12 + $0x248] sm:$0xff]  ;;  %v192_v17 = vld [vmem:[%s1768_s12 + $0x240] sm:$0xff] }
  0x29   : > { %v596_v20 = vsel %vm376_vm0, %v193_v16, 0.0  ;;  %v593_v21 = vsel %vm376_vm0, %v192_v17, 0.0  ;;  %v209_v16 = vld [vmem:[%s1768_s12 + $0x2c8] sm:$0xff]  ;;  %v208_v17 = vld [vmem:[%s1768_s12 + $0x2c0] sm:$0xff] }
  0x2a   : > { %417 = vadd.xlane.f32.xlu1 %v416_v26  ;;  %414 = vadd.xlane.f32.xlu0 %v413_v27  ;;  %v512_v26 = vsel %vm376_vm0, %v165_v24, 0.0  ;;  %v509_v27 = vsel %vm376_vm0, %v164_v25, 0.0  ;;  %v195_v24 = vld [vmem:[%s1768_s12 + $0x258] sm:$0xff]  ;;  %v194_v25 = vld [vmem:[%s1768_s12 + $0x250] sm:$0xff] }
  0x2e   : > { %423 = vadd.xlane.f32.xlu1 %v422_v30  ;;  %420 = vadd.xlane.f32.xlu0 %v419_v31  ;;  %v518_v30 = vsel %vm376_vm0, %v167_v28, 0.0  ;;  %v515_v31 = vsel %vm376_vm0, %v166_v29, 0.0  ;;  %v602_v28 = vsel %vm376_vm0, %v195_v24, 0.0  ;;  %v599_v29 = vsel %vm376_vm0, %v194_v25, 0.0  ;;  %v211_v24 = vld [vmem:[%s1768_s12 + $0x2d8] sm:$0xff]  ;;  %v210_v25 = vld [vmem:[%s1768_s12 + $0x2d0] sm:$0xff] }
  0x32   : > { %429 = vadd.xlane.f32.xlu1 %v428_v34  ;;  %426 = vadd.xlane.f32.xlu0 %v425_v35  ;;  %v524_v34 = vsel %vm376_vm0, %v169_v32, 0.0  ;;  %v521_v35 = vsel %vm376_vm0, %v168_v33, 0.0  ;;  %v197_v32 = vld [vmem:[%s1768_s12 + $0x268] sm:$0xff]  ;;  %v196_v33 = vld [vmem:[%s1768_s12 + $0x260] sm:$0xff] }
  0x36   : > { %435 = vadd.xlane.f32.xlu1 %v434_v38  ;;  %432 = vadd.xlane.f32.xlu0 %v431_v39  ;;  %v530_v38 = vsel %vm376_vm0, %v171_v36, 0.0  ;;  %v527_v39 = vsel %vm376_vm0, %v170_v37, 0.0  ;;  %v608_v36 = vsel %vm376_vm0, %v197_v32, 0.0  ;;  %v605_v37 = vsel %vm376_vm0, %v196_v33, 0.0  ;;  %v213_v32 = vld [vmem:[%s1768_s12 + $0x2e8] sm:$0xff]  ;;  %v212_v33 = vld [vmem:[%s1768_s12 + $0x2e0] sm:$0xff] }
  0x3a   : > { %441 = vadd.xlane.f32.xlu1 %v440_v42  ;;  %438 = vadd.xlane.f32.xlu0 %v437_v43  ;;  %v536_v42 = vsel %vm376_vm0, %v173_v40, 0.0  ;;  %v533_v43 = vsel %vm376_vm0, %v172_v41, 0.0  ;;  %v199_v40 = vld [vmem:[%s1768_s12 + $0x278] sm:$0xff]  ;;  %v198_v41 = vld [vmem:[%s1768_s12 + $0x270] sm:$0xff] }
  0x3e   : > { %447 = vadd.xlane.f32.xlu1 %v446_v46  ;;  %444 = vadd.xlane.f32.xlu0 %v443_v47  ;;  %v542_v46 = vsel %vm376_vm0, %v175_v44, 0.0  ;;  %v539_v47 = vsel %vm376_vm0, %v174_v45, 0.0  ;;  %v614_v44 = vsel %vm376_vm0, %v199_v40, 0.0  ;;  %v611_v45 = vsel %vm376_vm0, %v198_v41, 0.0  ;;  %v215_v40 = vld [vmem:[%s1768_s12 + $0x2f8] sm:$0xff]  ;;  %v214_v41 = vld [vmem:[%s1768_s12 + $0x2f0] sm:$0xff] }
  0x42   : > { %453 = vadd.xlane.f32.xlu1 %v452_v50  ;;  %450 = vadd.xlane.f32.xlu0 %v449_v51  ;;  %v548_v50 = vsel %vm376_vm0, %v177_v48, 0.0  ;;  %v545_v51 = vsel %vm376_vm0, %v176_v49, 0.0  ;;  %v201_v48 = vld [vmem:[%s1768_s12 + $0x288] sm:$0xff]  ;;  %v200_v49 = vld [vmem:[%s1768_s12 + $0x280] sm:$0xff] }
  0x46   : > { %459 = vadd.xlane.f32.xlu1 %v458_v54  ;;  %456 = vadd.xlane.f32.xlu0 %v455_v55  ;;  %v554_v54 = vsel %vm376_vm0, %v179_v52, 0.0  ;;  %v551_v55 = vsel %vm376_vm0, %v178_v53, 0.0  ;;  %v620_v52 = vsel %vm376_vm0, %v201_v48, 0.0  ;;  %v617_v53 = vsel %vm376_vm0, %v200_v49, 0.0  ;;  %v217_v48 = vld [vmem:[%s1768_s12 + $0x308] sm:$0xff]  ;;  %v216_v49 = vld [vmem:[%s1768_s12 + $0x300] sm:$0xff] }
  0x4a   : > { %465 = vadd.xlane.f32.xlu1 %v464_v58  ;;  %462 = vadd.xlane.f32.xlu0 %v461_v59  ;;  %v560_v58 = vsel %vm376_vm0, %v181_v56, 0.0  ;;  %v557_v59 = vsel %vm376_vm0, %v180_v57, 0.0  ;;  %v203_v56 = vld [vmem:[%s1768_s12 + $0x298] sm:$0xff]  ;;  %v202_v57 = vld [vmem:[%s1768_s12 + $0x290] sm:$0xff] }
  0x4e   : > { %471 = vadd.xlane.f32.xlu1 %v470_v62  ;;  %468 = vadd.xlane.f32.xlu0 %v467_v63  ;;  %v566_v62 = vsel %vm376_vm0, %v183_v60, 0.0  ;;  %v563_v63 = vsel %vm376_vm0, %v182_v61, 0.0  ;;  %v626_v60 = vsel %vm376_vm0, %v203_v56, 0.0  ;;  %v623_v61 = vsel %vm376_vm0, %v202_v57, 0.0  ;;  %v219_v56 = vld [vmem:[%s1768_s12 + $0x318] sm:$0xff]  ;;  %v218_v57 = vld [vmem:[%s1768_s12 + $0x310] sm:$0xff] }
  0x52   : > { %477 = vadd.xlane.f32.xlu1 %v476_v2  ;;  %474 = vadd.xlane.f32.xlu0 %v473_v3  ;;  %v572_v2 = vsel %vm376_vm0, %v185_v0, 0.0  ;;  %v569_v3 = vsel %vm376_vm0, %v184_v1, 0.0  ;;  %v205_v0 = vld [vmem:[%s1768_s12 + $0x2a8] sm:$0xff]  ;;  %v204_v1 = vld [vmem:[%s1768_s12 + $0x2a0] sm:$0xff] }
  0x56   : > { %483 = vadd.xlane.f32.xlu1 %v482_v6  ;;  %480 = vadd.xlane.f32.xlu0 %v479_v7  ;;  %v578_v6 = vsel %vm376_vm0, %v187_v4, 0.0  ;;  %v575_v7 = vsel %vm376_vm0, %v186_v5, 0.0  ;;  %v632_v4 = vsel %vm376_vm0, %v205_v0, 0.0  ;;  %v629_v5 = vsel %vm376_vm0, %v204_v1, 0.0  ;;  %v221_v0 = vld [vmem:[%s1768_s12 + $0x328] sm:$0xff]  ;;  %v220_v1 = vld [vmem:[%s1768_s12 + $0x320] sm:$0xff] }
  0x5a   : > { %489 = vadd.xlane.f32.xlu1 %v488_v10  ;;  %486 = vadd.xlane.f32.xlu0 %v485_v11  ;;  %v584_v10 = vsel %vm376_vm0, %v189_v8, 0.0  ;;  %v581_v11 = vsel %vm376_vm0, %v188_v9, 0.0  ;;  %v207_v8 = vld [vmem:[%s1768_s12 + $0x2b8] sm:$0xff]  ;;  %v206_v9 = vld [vmem:[%s1768_s12 + $0x2b0] sm:$0xff] }
  0x5e   : > { %495 = vadd.xlane.f32.xlu1 %v494_v14  ;;  %492 = vadd.xlane.f32.xlu0 %v491_v15  ;;  %v590_v14 = vsel %vm376_vm0, %v191_v12, 0.0  ;;  %v587_v15 = vsel %vm376_vm0, %v190_v13, 0.0  ;;  %v638_v12 = vsel %vm376_vm0, %v207_v8, 0.0  ;;  %v635_v13 = vsel %vm376_vm0, %v206_v9, 0.0  ;;  %v223_v8 = vld [vmem:[%s1768_s12 + $0x338] sm:$0xff]  ;;  %v222_v9 = vld [vmem:[%s1768_s12 + $0x330] sm:$0xff] }
  0x62   : > { %501 = vadd.xlane.f32.xlu1 %v500_v18  ;;  %498 = vadd.xlane.f32.xlu0 %v497_v19 }
  0x66   : > { %507 = vadd.xlane.f32.xlu1 %v506_v22  ;;  %504 = vadd.xlane.f32.xlu0 %v503_v23 }
  0x6a   : > { %513 = vadd.xlane.f32.xlu1 %v512_v26  ;;  %510 = vadd.xlane.f32.xlu0 %v509_v27 }
  0x6e   : > { %519 = vadd.xlane.f32.xlu1 %v518_v30  ;;  %516 = vadd.xlane.f32.xlu0 %v515_v31 }
  0x72   : > { %525 = vadd.xlane.f32.xlu1 %v524_v34  ;;  %522 = vadd.xlane.f32.xlu0 %v521_v35 }
  0x76   : > { %531 = vadd.xlane.f32.xlu1 %v530_v38  ;;  %528 = vadd.xlane.f32.xlu0 %v527_v39 }
  0x7a   : > { %537 = vadd.xlane.f32.xlu1 %v536_v42  ;;  %534 = vadd.xlane.f32.xlu0 %v533_v43 }
  0x7e   : > { %543 = vadd.xlane.f32.xlu1 %v542_v46  ;;  %540 = vadd.xlane.f32.xlu0 %v539_v47 }
  0x82   : > { %549 = vadd.xlane.f32.xlu1 %v548_v50  ;;  %546 = vadd.xlane.f32.xlu0 %v545_v51 }
  0x86   : > { %555 = vadd.xlane.f32.xlu1 %v554_v54  ;;  %552 = vadd.xlane.f32.xlu0 %v551_v55 }
  0x8a   : > { %561 = vadd.xlane.f32.xlu1 %v560_v58  ;;  %558 = vadd.xlane.f32.xlu0 %v557_v59 }
  0x8e   : > { %567 = vadd.xlane.f32.xlu1 %v566_v62  ;;  %564 = vadd.xlane.f32.xlu0 %v563_v63 }
  0x92   : > { %573 = vadd.xlane.f32.xlu1 %v572_v2  ;;  %570 = vadd.xlane.f32.xlu0 %v569_v3 }
  0x96   : > { %579 = vadd.xlane.f32.xlu1 %v578_v6  ;;  %576 = vadd.xlane.f32.xlu0 %v575_v7 }
  0x9a   : > { %585 = vadd.xlane.f32.xlu1 %v584_v10  ;;  %582 = vadd.xlane.f32.xlu0 %v581_v11 }
  0x9e   : > { %591 = vadd.xlane.f32.xlu1 %v590_v14  ;;  %588 = vadd.xlane.f32.xlu0 %v587_v15 }
  0x9f   : > { %v385_v18 = vpop.xlane.xlu1 %384  ;;  %v379_v19 = vpop.xlane.xlu0 %378 }
  0xa0   : > { %v1148_v22 = vmul.f32 0.020408163, %v385_v18  ;;  %v1146_v23 = vmul.f32 0.020408163, %v379_v19 }
  0xa2   : > { %1405 = vst.msk [vmem:[%s1921_s15 + $0x10] sm:$0xff] %vm1402_vm1, %v1148_v22  ;;  %1403 = vst.msk [vmem:[%s1921_s15] sm:$0xff] %vm1402_vm1, %v1146_v23  ;;  %597 = vadd.xlane.f32.xlu1 %v596_v20  ;;  %594 = vadd.xlane.f32.xlu0 %v593_v21  ;;  %v644_v20 = vsel %vm376_vm0, %v209_v16, 0.0  ;;  %v641_v21 = vsel %vm376_vm0, %v208_v17, 0.0  ;;  %v225_v16 = vld [vmem:[%s1768_s12 + $0x348] sm:$0xff]  ;;  %v224_v17 = vld [vmem:[%s1768_s12 + $0x340] sm:$0xff] }
  0xa3   : > { %v388_v26 = vpop.xlane.xlu1 %387  ;;  %v382_v27 = vpop.xlane.xlu0 %381 }
  0xa4   : > { %v1149_v30 = vmul.f32 0.020408163, %v388_v26  ;;  %v1147_v31 = vmul.f32 0.020408163, %v382_v27 }
  0xa6   : > { %1406 = vst.msk [vmem:[%s1921_s15 + $0x18] sm:$0xff] %vm1402_vm1, %v1149_v30  ;;  %1404 = vst.msk [vmem:[%s1921_s15 + $0x8] sm:$0xff] %vm1402_vm1, %v1147_v31  ;;  %603 = vadd.xlane.f32.xlu1 %v602_v28  ;;  %600 = vadd.xlane.f32.xlu0 %v599_v29  ;;  %v650_v28 = vsel %vm376_vm0, %v211_v24, 0.0  ;;  %v647_v29 = vsel %vm376_vm0, %v210_v25, 0.0  ;;  %v227_v24 = vld [vmem:[%s1768_s12 + $0x358] sm:$0xff]  ;;  %v226_v25 = vld [vmem:[%s1768_s12 + $0x350] sm:$0xff] }
  0xa7   : > { %v394_v34 = vpop.xlane.xlu1 %393  ;;  %v391_v35 = vpop.xlane.xlu0 %390 }
  0xa8   : > { %v1151_v38 = vmul.f32 0.020408163, %v394_v34  ;;  %v1150_v39 = vmul.f32 0.020408163, %v391_v35 }
  0xaa   : > { %1408 = vst.msk [vmem:[%s1921_s15 + $0x28] sm:$0xff] %vm1402_vm1, %v1151_v38  ;;  %1407 = vst.msk [vmem:[%s1921_s15 + $0x20] sm:$0xff] %vm1402_vm1, %v1150_v39  ;;  %609 = vadd.xlane.f32.xlu1 %v608_v36  ;;  %606 = vadd.xlane.f32.xlu0 %v605_v37  ;;  %v656_v36 = vsel %vm376_vm0, %v213_v32, 0.0  ;;  %v653_v37 = vsel %vm376_vm0, %v212_v33, 0.0  ;;  %v229_v32 = vld [vmem:[%s1768_s12 + $0x368] sm:$0xff]  ;;  %v228_v33 = vld [vmem:[%s1768_s12 + $0x360] sm:$0xff] }
  0xab   : > { %v400_v42 = vpop.xlane.xlu1 %399  ;;  %v397_v43 = vpop.xlane.xlu0 %396 }
  0xac   : > { %v1153_v46 = vmul.f32 0.020408163, %v400_v42  ;;  %v1152_v47 = vmul.f32 0.020408163, %v397_v43 }
  0xae   : > { %1410 = vst.msk [vmem:[%s1921_s15 + $0x38] sm:$0xff] %vm1402_vm1, %v1153_v46  ;;  %1409 = vst.msk [vmem:[%s1921_s15 + $0x30] sm:$0xff] %vm1402_vm1, %v1152_v47  ;;  %615 = vadd.xlane.f32.xlu1 %v614_v44  ;;  %612 = vadd.xlane.f32.xlu0 %v611_v45  ;;  %v662_v44 = vsel %vm376_vm0, %v215_v40, 0.0  ;;  %v659_v45 = vsel %vm376_vm0, %v214_v41, 0.0  ;;  %v231_v40 = vld [vmem:[%s1768_s12 + $0x378] sm:$0xff]  ;;  %v230_v41 = vld [vmem:[%s1768_s12 + $0x370] sm:$0xff] }
  0xaf   : > { %v406_v50 = vpop.xlane.xlu1 %405  ;;  %v403_v51 = vpop.xlane.xlu0 %402 }
  0xb0   : > { %v1155_v54 = vmul.f32 0.020408163, %v406_v50  ;;  %v1154_v55 = vmul.f32 0.020408163, %v403_v51 }
  0xb2   : > { %1412 = vst.msk [vmem:[%s1921_s15 + $0x48] sm:$0xff] %vm1402_vm1, %v1155_v54  ;;  %1411 = vst.msk [vmem:[%s1921_s15 + $0x40] sm:$0xff] %vm1402_vm1, %v1154_v55  ;;  %621 = vadd.xlane.f32.xlu1 %v620_v52  ;;  %618 = vadd.xlane.f32.xlu0 %v617_v53  ;;  %v668_v52 = vsel %vm376_vm0, %v217_v48, 0.0  ;;  %v665_v53 = vsel %vm376_vm0, %v216_v49, 0.0  ;;  %v233_v48 = vld [vmem:[%s1768_s12 + $0x388] sm:$0xff]  ;;  %v232_v49 = vld [vmem:[%s1768_s12 + $0x380] sm:$0xff] }
  0xb3   : > { %v412_v58 = vpop.xlane.xlu1 %411  ;;  %v409_v59 = vpop.xlane.xlu0 %408 }
  0xb4   : > { %v1157_v62 = vmul.f32 0.020408163, %v412_v58  ;;  %v1156_v63 = vmul.f32 0.020408163, %v409_v59 }
  0xb6   : > { %1414 = vst.msk [vmem:[%s1921_s15 + $0x58] sm:$0xff] %vm1402_vm1, %v1157_v62  ;;  %1413 = vst.msk [vmem:[%s1921_s15 + $0x50] sm:$0xff] %vm1402_vm1, %v1156_v63  ;;  %627 = vadd.xlane.f32.xlu1 %v626_v60  ;;  %624 = vadd.xlane.f32.xlu0 %v623_v61  ;;  %v674_v60 = vsel %vm376_vm0, %v219_v56, 0.0  ;;  %v671_v61 = vsel %vm376_vm0, %v218_v57, 0.0  ;;  %v235_v56 = vld [vmem:[%s1768_s12 + $0x398] sm:$0xff]  ;;  %v234_v57 = vld [vmem:[%s1768_s12 + $0x390] sm:$0xff] }
  0xb7   : > { %v418_v2 = vpop.xlane.xlu1 %417  ;;  %v415_v3 = vpop.xlane.xlu0 %414 }
  0xb8   : > { %v1159_v6 = vmul.f32 0.020408163, %v418_v2  ;;  %v1158_v7 = vmul.f32 0.020408163, %v415_v3 }
  0xba   : > { %1416 = vst.msk [vmem:[%s1921_s15 + $0x68] sm:$0xff] %vm1402_vm1, %v1159_v6  ;;  %1415 = vst.msk [vmem:[%s1921_s15 + $0x60] sm:$0xff] %vm1402_vm1, %v1158_v7  ;;  %633 = vadd.xlane.f32.xlu1 %v632_v4  ;;  %630 = vadd.xlane.f32.xlu0 %v629_v5  ;;  %v680_v4 = vsel %vm376_vm0, %v221_v0, 0.0  ;;  %v677_v5 = vsel %vm376_vm0, %v220_v1, 0.0  ;;  %v237_v0 = vld [vmem:[%s1768_s12 + $0x3a8] sm:$0xff]  ;;  %v236_v1 = vld [vmem:[%s1768_s12 + $0x3a0] sm:$0xff] }
  0xbb   : > { %v424_v10 = vpop.xlane.xlu1 %423  ;;  %v421_v11 = vpop.xlane.xlu0 %420 }
  0xbc   : > { %v1161_v14 = vmul.f32 0.020408163, %v424_v10  ;;  %v1160_v15 = vmul.f32 0.020408163, %v421_v11 }
  0xbe   : > { %1418 = vst.msk [vmem:[%s1921_s15 + $0x78] sm:$0xff] %vm1402_vm1, %v1161_v14  ;;  %1417 = vst.msk [vmem:[%s1921_s15 + $0x70] sm:$0xff] %vm1402_vm1, %v1160_v15  ;;  %639 = vadd.xlane.f32.xlu1 %v638_v12  ;;  %636 = vadd.xlane.f32.xlu0 %v635_v13  ;;  %v686_v12 = vsel %vm376_vm0, %v223_v8, 0.0  ;;  %v683_v13 = vsel %vm376_vm0, %v222_v9, 0.0  ;;  %v239_v8 = vld [vmem:[%s1768_s12 + $0x3b8] sm:$0xff]  ;;  %v238_v9 = vld [vmem:[%s1768_s12 + $0x3b0] sm:$0xff] }
  0xbf   : > { %v430_v18 = vpop.xlane.xlu1 %429  ;;  %v427_v19 = vpop.xlane.xlu0 %426 }
  0xc0   : > { %v1163_v22 = vmul.f32 0.020408163, %v430_v18  ;;  %v1162_v23 = vmul.f32 0.020408163, %v427_v19 }
  0xc2   : > { %1420 = vst.msk [vmem:[%s1921_s15 + $0x88] sm:$0xff] %vm1402_vm1, %v1163_v22  ;;  %1419 = vst.msk [vmem:[%s1921_s15 + $0x80] sm:$0xff] %vm1402_vm1, %v1162_v23  ;;  %645 = vadd.xlane.f32.xlu1 %v644_v20  ;;  %642 = vadd.xlane.f32.xlu0 %v641_v21  ;;  %v692_v20 = vsel %vm376_vm0, %v225_v16, 0.0  ;;  %v689_v21 = vsel %vm376_vm0, %v224_v17, 0.0  ;;  %v241_v16 = vld [vmem:[%s1768_s12 + $0x3c8] sm:$0xff]  ;;  %v240_v17 = vld [vmem:[%s1768_s12 + $0x3c0] sm:$0xff] }
  0xc3   : > { %v436_v26 = vpop.xlane.xlu1 %435  ;;  %v433_v27 = vpop.xlane.xlu0 %432 }
  0xc4   : > { %v1165_v30 = vmul.f32 0.020408163, %v436_v26  ;;  %v1164_v31 = vmul.f32 0.020408163, %v433_v27 }
  0xc6   : > { %1422 = vst.msk [vmem:[%s1921_s15 + $0x98] sm:$0xff] %vm1402_vm1, %v1165_v30  ;;  %1421 = vst.msk [vmem:[%s1921_s15 + $0x90] sm:$0xff] %vm1402_vm1, %v1164_v31  ;;  %651 = vadd.xlane.f32.xlu1 %v650_v28  ;;  %648 = vadd.xlane.f32.xlu0 %v647_v29  ;;  %v698_v28 = vsel %vm376_vm0, %v227_v24, 0.0  ;;  %v695_v29 = vsel %vm376_vm0, %v226_v25, 0.0  ;;  %v243_v24 = vld [vmem:[%s1768_s12 + $0x3d8] sm:$0xff]  ;;  %v242_v25 = vld [vmem:[%s1768_s12 + $0x3d0] sm:$0xff] }
  0xc7   : > { %v442_v34 = vpop.xlane.xlu1 %441  ;;  %v439_v35 = vpop.xlane.xlu0 %438 }
  0xc8   : > { %v1167_v38 = vmul.f32 0.020408163, %v442_v34  ;;  %v1166_v39 = vmul.f32 0.020408163, %v439_v35 }
  0xca   : > { %1424 = vst.msk [vmem:[%s1921_s15 + $0xa8] sm:$0xff] %vm1402_vm1, %v1167_v38  ;;  %1423 = vst.msk [vmem:[%s1921_s15 + $0xa0] sm:$0xff] %vm1402_vm1, %v1166_v39  ;;  %657 = vadd.xlane.f32.xlu1 %v656_v36  ;;  %654 = vadd.xlane.f32.xlu0 %v653_v37  ;;  %v704_v36 = vsel %vm376_vm0, %v229_v32, 0.0  ;;  %v701_v37 = vsel %vm376_vm0, %v228_v33, 0.0  ;;  %v245_v32 = vld [vmem:[%s1768_s12 + $0x3e8] sm:$0xff]  ;;  %v244_v33 = vld [vmem:[%s1768_s12 + $0x3e0] sm:$0xff] }
  0xcb   : > { %v448_v42 = vpop.xlane.xlu1 %447  ;;  %v445_v43 = vpop.xlane.xlu0 %444 }
  0xcc   : > { %v1169_v46 = vmul.f32 0.020408163, %v448_v42  ;;  %v1168_v47 = vmul.f32 0.020408163, %v445_v43 }
  0xce   : > { %1426 = vst.msk [vmem:[%s1921_s15 + $0xb8] sm:$0xff] %vm1402_vm1, %v1169_v46  ;;  %1425 = vst.msk [vmem:[%s1921_s15 + $0xb0] sm:$0xff] %vm1402_vm1, %v1168_v47  ;;  %663 = vadd.xlane.f32.xlu1 %v662_v44  ;;  %660 = vadd.xlane.f32.xlu0 %v659_v45  ;;  %v710_v44 = vsel %vm376_vm0, %v231_v40, 0.0  ;;  %v707_v45 = vsel %vm376_vm0, %v230_v41, 0.0  ;;  %v247_v40 = vld [vmem:[%s1768_s12 + $0x3f8] sm:$0xff]  ;;  %v246_v41 = vld [vmem:[%s1768_s12 + $0x3f0] sm:$0xff] }
  0xcf   : > { %v454_v50 = vpop.xlane.xlu1 %453  ;;  %v451_v51 = vpop.xlane.xlu0 %450 }
  0xd0   : > { %v1171_v54 = vmul.f32 0.020408163, %v454_v50  ;;  %v1170_v55 = vmul.f32 0.020408163, %v451_v51 }
  0xd2   : > { %1428 = vst.msk [vmem:[%s1921_s15 + $0xc8] sm:$0xff] %vm1402_vm1, %v1171_v54  ;;  %1427 = vst.msk [vmem:[%s1921_s15 + $0xc0] sm:$0xff] %vm1402_vm1, %v1170_v55  ;;  %669 = vadd.xlane.f32.xlu1 %v668_v52  ;;  %666 = vadd.xlane.f32.xlu0 %v665_v53  ;;  %v716_v52 = vsel %vm376_vm0, %v233_v48, 0.0  ;;  %v713_v53 = vsel %vm376_vm0, %v232_v49, 0.0  ;;  %v249_v48 = vld [vmem:[%s1768_s12 + $0x408] sm:$0xff]  ;;  %v248_v49 = vld [vmem:[%s1768_s12 + $0x400] sm:$0xff] }
  0xd3   : > { %v460_v58 = vpop.xlane.xlu1 %459  ;;  %v457_v59 = vpop.xlane.xlu0 %456 }
  0xd4   : > { %v1173_v62 = vmul.f32 0.020408163, %v460_v58  ;;  %v1172_v63 = vmul.f32 0.020408163, %v457_v59 }
  0xd6   : > { %1430 = vst.msk [vmem:[%s1921_s15 + $0xd8] sm:$0xff] %vm1402_vm1, %v1173_v62  ;;  %1429 = vst.msk [vmem:[%s1921_s15 + $0xd0] sm:$0xff] %vm1402_vm1, %v1172_v63  ;;  %675 = vadd.xlane.f32.xlu1 %v674_v60  ;;  %672 = vadd.xlane.f32.xlu0 %v671_v61  ;;  %v722_v60 = vsel %vm376_vm0, %v235_v56, 0.0  ;;  %v719_v61 = vsel %vm376_vm0, %v234_v57, 0.0  ;;  %v251_v56 = vld [vmem:[%s1768_s12 + $0x418] sm:$0xff]  ;;  %v250_v57 = vld [vmem:[%s1768_s12 + $0x410] sm:$0xff] }
  0xd7   : > { %v466_v2 = vpop.xlane.xlu1 %465  ;;  %v463_v3 = vpop.xlane.xlu0 %462 }
  0xd8   : > { %v1175_v6 = vmul.f32 0.020408163, %v466_v2  ;;  %v1174_v7 = vmul.f32 0.020408163, %v463_v3 }
  0xda   : > { %1432 = vst.msk [vmem:[%s1921_s15 + $0xe8] sm:$0xff] %vm1402_vm1, %v1175_v6  ;;  %1431 = vst.msk [vmem:[%s1921_s15 + $0xe0] sm:$0xff] %vm1402_vm1, %v1174_v7  ;;  %681 = vadd.xlane.f32.xlu1 %v680_v4  ;;  %678 = vadd.xlane.f32.xlu0 %v677_v5  ;;  %v728_v4 = vsel %vm376_vm0, %v237_v0, 0.0  ;;  %v725_v5 = vsel %vm376_vm0, %v236_v1, 0.0  ;;  %v253_v0 = vld [vmem:[%s1768_s12 + $0x428] sm:$0xff]  ;;  %v252_v1 = vld [vmem:[%s1768_s12 + $0x420] sm:$0xff] }
  0xdb   : > { %v472_v10 = vpop.xlane.xlu1 %471  ;;  %v469_v11 = vpop.xlane.xlu0 %468 }
  0xdc   : > { %v1177_v14 = vmul.f32 0.020408163, %v472_v10  ;;  %v1176_v15 = vmul.f32 0.020408163, %v469_v11 }
  0xde   : > { %1434 = vst.msk [vmem:[%s1921_s15 + $0xf8] sm:$0xff] %vm1402_vm1, %v1177_v14  ;;  %1433 = vst.msk [vmem:[%s1921_s15 + $0xf0] sm:$0xff] %vm1402_vm1, %v1176_v15  ;;  %687 = vadd.xlane.f32.xlu1 %v686_v12  ;;  %684 = vadd.xlane.f32.xlu0 %v683_v13  ;;  %v734_v12 = vsel %vm376_vm0, %v239_v8, 0.0  ;;  %v731_v13 = vsel %vm376_vm0, %v238_v9, 0.0  ;;  %v255_v8 = vld [vmem:[%s1768_s12 + $0x438] sm:$0xff]  ;;  %v254_v9 = vld [vmem:[%s1768_s12 + $0x430] sm:$0xff] }
  0xdf   : > { %v478_v18 = vpop.xlane.xlu1 %477  ;;  %v475_v19 = vpop.xlane.xlu0 %474 }
  0xe0   : > { %v1179_v22 = vmul.f32 0.020408163, %v478_v18  ;;  %v1178_v23 = vmul.f32 0.020408163, %v475_v19 }
  0xe2   : > { %1436 = vst.msk [vmem:[%s1921_s15 + $0x108] sm:$0xff] %vm1402_vm1, %v1179_v22  ;;  %1435 = vst.msk [vmem:[%s1921_s15 + $0x100] sm:$0xff] %vm1402_vm1, %v1178_v23  ;;  %693 = vadd.xlane.f32.xlu1 %v692_v20  ;;  %690 = vadd.xlane.f32.xlu0 %v689_v21  ;;  %v740_v20 = vsel %vm376_vm0, %v241_v16, 0.0  ;;  %v737_v21 = vsel %vm376_vm0, %v240_v17, 0.0  ;;  %v257_v16 = vld [vmem:[%s1768_s12 + $0x448] sm:$0xff]  ;;  %v256_v17 = vld [vmem:[%s1768_s12 + $0x440] sm:$0xff] }
  0xe3   : > { %v484_v26 = vpop.xlane.xlu1 %483  ;;  %v481_v27 = vpop.xlane.xlu0 %480 }
  0xe4   : > { %v1181_v30 = vmul.f32 0.020408163, %v484_v26  ;;  %v1180_v31 = vmul.f32 0.020408163, %v481_v27 }
  0xe6   : > { %1438 = vst.msk [vmem:[%s1921_s15 + $0x118] sm:$0xff] %vm1402_vm1, %v1181_v30  ;;  %1437 = vst.msk [vmem:[%s1921_s15 + $0x110] sm:$0xff] %vm1402_vm1, %v1180_v31  ;;  %699 = vadd.xlane.f32.xlu1 %v698_v28  ;;  %696 = vadd.xlane.f32.xlu0 %v695_v29  ;;  %v746_v28 = vsel %vm376_vm0, %v243_v24, 0.0  ;;  %v743_v29 = vsel %vm376_vm0, %v242_v25, 0.0  ;;  %v259_v24 = vld [vmem:[%s1768_s12 + $0x458] sm:$0xff]  ;;  %v258_v25 = vld [vmem:[%s1768_s12 + $0x450] sm:$0xff] }
  0xe7   : > { %v490_v34 = vpop.xlane.xlu1 %489  ;;  %v487_v35 = vpop.xlane.xlu0 %486 }
  0xe8   : > { %v1183_v38 = vmul.f32 0.020408163, %v490_v34  ;;  %v1182_v39 = vmul.f32 0.020408163, %v487_v35 }
  0xea   : > { %1440 = vst.msk [vmem:[%s1921_s15 + $0x128] sm:$0xff] %vm1402_vm1, %v1183_v38  ;;  %1439 = vst.msk [vmem:[%s1921_s15 + $0x120] sm:$0xff] %vm1402_vm1, %v1182_v39  ;;  %705 = vadd.xlane.f32.xlu1 %v704_v36  ;;  %702 = vadd.xlane.f32.xlu0 %v701_v37  ;;  %v752_v36 = vsel %vm376_vm0, %v245_v32, 0.0  ;;  %v749_v37 = vsel %vm376_vm0, %v244_v33, 0.0  ;;  %v261_v32 = vld [vmem:[%s1768_s12 + $0x468] sm:$0xff]  ;;  %v260_v33 = vld [vmem:[%s1768_s12 + $0x460] sm:$0xff] }
  0xeb   : > { %v496_v42 = vpop.xlane.xlu1 %495  ;;  %v493_v43 = vpop.xlane.xlu0 %492 }
  0xec   : > { %v1185_v46 = vmul.f32 0.020408163, %v496_v42  ;;  %v1184_v47 = vmul.f32 0.020408163, %v493_v43 }
  0xee   : > { %1442 = vst.msk [vmem:[%s1921_s15 + $0x138] sm:$0xff] %vm1402_vm1, %v1185_v46  ;;  %1441 = vst.msk [vmem:[%s1921_s15 + $0x130] sm:$0xff] %vm1402_vm1, %v1184_v47  ;;  %711 = vadd.xlane.f32.xlu1 %v710_v44  ;;  %708 = vadd.xlane.f32.xlu0 %v707_v45  ;;  %v758_v44 = vsel %vm376_vm0, %v247_v40, 0.0  ;;  %v755_v45 = vsel %vm376_vm0, %v246_v41, 0.0  ;;  %v263_v40 = vld [vmem:[%s1768_s12 + $0x478] sm:$0xff]  ;;  %v262_v41 = vld [vmem:[%s1768_s12 + $0x470] sm:$0xff] }
  0xef   : > { %v502_v50 = vpop.xlane.xlu1 %501  ;;  %v499_v51 = vpop.xlane.xlu0 %498 }
  0xf0   : > { %v1187_v54 = vmul.f32 0.020408163, %v502_v50  ;;  %v1186_v55 = vmul.f32 0.020408163, %v499_v51 }
  0xf2   : > { %1444 = vst.msk [vmem:[%s1921_s15 + $0x148] sm:$0xff] %vm1402_vm1, %v1187_v54  ;;  %1443 = vst.msk [vmem:[%s1921_s15 + $0x140] sm:$0xff] %vm1402_vm1, %v1186_v55  ;;  %717 = vadd.xlane.f32.xlu1 %v716_v52  ;;  %714 = vadd.xlane.f32.xlu0 %v713_v53  ;;  %v764_v52 = vsel %vm376_vm0, %v249_v48, 0.0  ;;  %v761_v53 = vsel %vm376_vm0, %v248_v49, 0.0  ;;  %v265_v48 = vld [vmem:[%s1768_s12 + $0x488] sm:$0xff]  ;;  %v264_v49 = vld [vmem:[%s1768_s12 + $0x480] sm:$0xff] }
  0xf3   : > { %v508_v58 = vpop.xlane.xlu1 %507  ;;  %v505_v59 = vpop.xlane.xlu0 %504 }
  0xf4   : > { %v1189_v62 = vmul.f32 0.020408163, %v508_v58  ;;  %v1188_v63 = vmul.f32 0.020408163, %v505_v59 }
  0xf6   : > { %1446 = vst.msk [vmem:[%s1921_s15 + $0x158] sm:$0xff] %vm1402_vm1, %v1189_v62  ;;  %1445 = vst.msk [vmem:[%s1921_s15 + $0x150] sm:$0xff] %vm1402_vm1, %v1188_v63  ;;  %723 = vadd.xlane.f32.xlu1 %v722_v60  ;;  %720 = vadd.xlane.f32.xlu0 %v719_v61  ;;  %v770_v60 = vsel %vm376_vm0, %v251_v56, 0.0  ;;  %v767_v61 = vsel %vm376_vm0, %v250_v57, 0.0  ;;  %v267_v56 = vld [vmem:[%s1768_s12 + $0x498] sm:$0xff]  ;;  %v266_v57 = vld [vmem:[%s1768_s12 + $0x490] sm:$0xff] }
  0xf7   : > { %v514_v2 = vpop.xlane.xlu1 %513  ;;  %v511_v3 = vpop.xlane.xlu0 %510 }
  0xf8   : > { %v1191_v6 = vmul.f32 0.020408163, %v514_v2  ;;  %v1190_v7 = vmul.f32 0.020408163, %v511_v3 }
  0xfa   : > { %1448 = vst.msk [vmem:[%s1921_s15 + $0x168] sm:$0xff] %vm1402_vm1, %v1191_v6  ;;  %1447 = vst.msk [vmem:[%s1921_s15 + $0x160] sm:$0xff] %vm1402_vm1, %v1190_v7  ;;  %729 = vadd.xlane.f32.xlu1 %v728_v4  ;;  %726 = vadd.xlane.f32.xlu0 %v725_v5  ;;  %v776_v4 = vsel %vm376_vm0, %v253_v0, 0.0  ;;  %v773_v5 = vsel %vm376_vm0, %v252_v1, 0.0  ;;  %v269_v0 = vld [vmem:[%s1768_s12 + $0x4a8] sm:$0xff]  ;;  %v268_v1 = vld [vmem:[%s1768_s12 + $0x4a0] sm:$0xff] }
  0xfb   : > { %v520_v10 = vpop.xlane.xlu1 %519  ;;  %v517_v11 = vpop.xlane.xlu0 %516 }
  0xfc   : > { %v1193_v14 = vmul.f32 0.020408163, %v520_v10  ;;  %v1192_v15 = vmul.f32 0.020408163, %v517_v11 }
  0xfe   : > { %1450 = vst.msk [vmem:[%s1921_s15 + $0x178] sm:$0xff] %vm1402_vm1, %v1193_v14  ;;  %1449 = vst.msk [vmem:[%s1921_s15 + $0x170] sm:$0xff] %vm1402_vm1, %v1192_v15  ;;  %735 = vadd.xlane.f32.xlu1 %v734_v12  ;;  %732 = vadd.xlane.f32.xlu0 %v731_v13  ;;  %v782_v12 = vsel %vm376_vm0, %v255_v8, 0.0  ;;  %v779_v13 = vsel %vm376_vm0, %v254_v9, 0.0  ;;  %v271_v8 = vld [vmem:[%s1768_s12 + $0x4b8] sm:$0xff]  ;;  %v270_v9 = vld [vmem:[%s1768_s12 + $0x4b0] sm:$0xff] }
  0xff   : > { %v526_v18 = vpop.xlane.xlu1 %525  ;;  %v523_v19 = vpop.xlane.xlu0 %522 }
 0x100   : > { %v1195_v22 = vmul.f32 0.020408163, %v526_v18  ;;  %v1194_v23 = vmul.f32 0.020408163, %v523_v19 }
 0x102   : > { %1452 = vst.msk [vmem:[%s1921_s15 + $0x188] sm:$0xff] %vm1402_vm1, %v1195_v22  ;;  %1451 = vst.msk [vmem:[%s1921_s15 + $0x180] sm:$0xff] %vm1402_vm1, %v1194_v23  ;;  %741 = vadd.xlane.f32.xlu1 %v740_v20  ;;  %738 = vadd.xlane.f32.xlu0 %v737_v21  ;;  %v788_v20 = vsel %vm376_vm0, %v257_v16, 0.0  ;;  %v785_v21 = vsel %vm376_vm0, %v256_v17, 0.0  ;;  %v273_v16 = vld [vmem:[%s1768_s12 + $0x4c8] sm:$0xff]  ;;  %v272_v17 = vld [vmem:[%s1768_s12 + $0x4c0] sm:$0xff] }
 0x103   : > { %v532_v26 = vpop.xlane.xlu1 %531  ;;  %v529_v27 = vpop.xlane.xlu0 %528 }
 0x104   : > { %v1197_v30 = vmul.f32 0.020408163, %v532_v26  ;;  %v1196_v31 = vmul.f32 0.020408163, %v529_v27 }
 0x106   : > { %1454 = vst.msk [vmem:[%s1921_s15 + $0x198] sm:$0xff] %vm1402_vm1, %v1197_v30  ;;  %1453 = vst.msk [vmem:[%s1921_s15 + $0x190] sm:$0xff] %vm1402_vm1, %v1196_v31  ;;  %747 = vadd.xlane.f32.xlu1 %v746_v28  ;;  %744 = vadd.xlane.f32.xlu0 %v743_v29  ;;  %v794_v28 = vsel %vm376_vm0, %v259_v24, 0.0  ;;  %v791_v29 = vsel %vm376_vm0, %v258_v25, 0.0  ;;  %v275_v24 = vld [vmem:[%s1768_s12 + $0x4d8] sm:$0xff]  ;;  %v274_v25 = vld [vmem:[%s1768_s12 + $0x4d0] sm:$0xff] }
 0x107   : > { %v538_v34 = vpop.xlane.xlu1 %537  ;;  %v535_v35 = vpop.xlane.xlu0 %534 }
 0x108   : > { %v1199_v38 = vmul.f32 0.020408163, %v538_v34  ;;  %v1198_v39 = vmul.f32 0.020408163, %v535_v35 }
 0x10a   : > { %1456 = vst.msk [vmem:[%s1921_s15 + $0x1a8] sm:$0xff] %vm1402_vm1, %v1199_v38  ;;  %1455 = vst.msk [vmem:[%s1921_s15 + $0x1a0] sm:$0xff] %vm1402_vm1, %v1198_v39  ;;  %753 = vadd.xlane.f32.xlu1 %v752_v36  ;;  %750 = vadd.xlane.f32.xlu0 %v749_v37  ;;  %v800_v36 = vsel %vm376_vm0, %v261_v32, 0.0  ;;  %v797_v37 = vsel %vm376_vm0, %v260_v33, 0.0  ;;  %v277_v32 = vld [vmem:[%s1768_s12 + $0x4e8] sm:$0xff]  ;;  %v276_v33 = vld [vmem:[%s1768_s12 + $0x4e0] sm:$0xff] }
 0x10b   : > { %v544_v42 = vpop.xlane.xlu1 %543  ;;  %v541_v43 = vpop.xlane.xlu0 %540 }
 0x10c   : > { %v1201_v46 = vmul.f32 0.020408163, %v544_v42  ;;  %v1200_v47 = vmul.f32 0.020408163, %v541_v43 }
 0x10e   : > { %1458 = vst.msk [vmem:[%s1921_s15 + $0x1b8] sm:$0xff] %vm1402_vm1, %v1201_v46  ;;  %1457 = vst.msk [vmem:[%s1921_s15 + $0x1b0] sm:$0xff] %vm1402_vm1, %v1200_v47  ;;  %759 = vadd.xlane.f32.xlu1 %v758_v44  ;;  %756 = vadd.xlane.f32.xlu0 %v755_v45  ;;  %v806_v44 = vsel %vm376_vm0, %v263_v40, 0.0  ;;  %v803_v45 = vsel %vm376_vm0, %v262_v41, 0.0  ;;  %v279_v40 = vld [vmem:[%s1768_s12 + $0x4f8] sm:$0xff]  ;;  %v278_v41 = vld [vmem:[%s1768_s12 + $0x4f0] sm:$0xff] }
 0x10f   : > { %v550_v50 = vpop.xlane.xlu1 %549  ;;  %v547_v51 = vpop.xlane.xlu0 %546 }
 0x110   : > { %v1203_v54 = vmul.f32 0.020408163, %v550_v50  ;;  %v1202_v55 = vmul.f32 0.020408163, %v547_v51 }
 0x112   : > { %1460 = vst.msk [vmem:[%s1921_s15 + $0x1c8] sm:$0xff] %vm1402_vm1, %v1203_v54  ;;  %1459 = vst.msk [vmem:[%s1921_s15 + $0x1c0] sm:$0xff] %vm1402_vm1, %v1202_v55  ;;  %765 = vadd.xlane.f32.xlu1 %v764_v52  ;;  %762 = vadd.xlane.f32.xlu0 %v761_v53  ;;  %v812_v52 = vsel %vm376_vm0, %v265_v48, 0.0  ;;  %v809_v53 = vsel %vm376_vm0, %v264_v49, 0.0  ;;  %v281_v48 = vld [vmem:[%s1768_s12 + $0x508] sm:$0xff]  ;;  %v280_v49 = vld [vmem:[%s1768_s12 + $0x500] sm:$0xff] }
 0x113   : > { %v556_v58 = vpop.xlane.xlu1 %555  ;;  %v553_v59 = vpop.xlane.xlu0 %552 }
 0x114   : > { %v1205_v62 = vmul.f32 0.020408163, %v556_v58  ;;  %v1204_v63 = vmul.f32 0.020408163, %v553_v59 }
 0x116   : > { %1462 = vst.msk [vmem:[%s1921_s15 + $0x1d8] sm:$0xff] %vm1402_vm1, %v1205_v62  ;;  %1461 = vst.msk [vmem:[%s1921_s15 + $0x1d0] sm:$0xff] %vm1402_vm1, %v1204_v63  ;;  %771 = vadd.xlane.f32.xlu1 %v770_v60  ;;  %768 = vadd.xlane.f32.xlu0 %v767_v61  ;;  %v818_v60 = vsel %vm376_vm0, %v267_v56, 0.0  ;;  %v815_v61 = vsel %vm376_vm0, %v266_v57, 0.0  ;;  %v283_v56 = vld [vmem:[%s1768_s12 + $0x518] sm:$0xff]  ;;  %v282_v57 = vld [vmem:[%s1768_s12 + $0x510] sm:$0xff] }
 0x117   : > { %v562_v2 = vpop.xlane.xlu1 %561  ;;  %v559_v3 = vpop.xlane.xlu0 %558 }
 0x118   : > { %v1207_v6 = vmul.f32 0.020408163, %v562_v2  ;;  %v1206_v7 = vmul.f32 0.020408163, %v559_v3 }
 0x11a   : > { %1464 = vst.msk [vmem:[%s1921_s15 + $0x1e8] sm:$0xff] %vm1402_vm1, %v1207_v6  ;;  %1463 = vst.msk [vmem:[%s1921_s15 + $0x1e0] sm:$0xff] %vm1402_vm1, %v1206_v7  ;;  %777 = vadd.xlane.f32.xlu1 %v776_v4  ;;  %774 = vadd.xlane.f32.xlu0 %v773_v5  ;;  %v824_v4 = vsel %vm376_vm0, %v269_v0, 0.0  ;;  %v821_v5 = vsel %vm376_vm0, %v268_v1, 0.0  ;;  %v285_v0 = vld [vmem:[%s1768_s12 + $0x528] sm:$0xff]  ;;  %v284_v1 = vld [vmem:[%s1768_s12 + $0x520] sm:$0xff] }
 0x11b   : > { %v568_v10 = vpop.xlane.xlu1 %567  ;;  %v565_v11 = vpop.xlane.xlu0 %564 }
 0x11c   : > { %v1209_v14 = vmul.f32 0.020408163, %v568_v10  ;;  %v1208_v15 = vmul.f32 0.020408163, %v565_v11 }
 0x11e   : > { %1466 = vst.msk [vmem:[%s1921_s15 + $0x1f8] sm:$0xff] %vm1402_vm1, %v1209_v14  ;;  %1465 = vst.msk [vmem:[%s1921_s15 + $0x1f0] sm:$0xff] %vm1402_vm1, %v1208_v15  ;;  %783 = vadd.xlane.f32.xlu1 %v782_v12  ;;  %780 = vadd.xlane.f32.xlu0 %v779_v13  ;;  %v830_v12 = vsel %vm376_vm0, %v271_v8, 0.0  ;;  %v827_v13 = vsel %vm376_vm0, %v270_v9, 0.0  ;;  %v287_v8 = vld [vmem:[%s1768_s12 + $0x538] sm:$0xff]  ;;  %v286_v9 = vld [vmem:[%s1768_s12 + $0x530] sm:$0xff] }
 0x11f   : > { %v574_v18 = vpop.xlane.xlu1 %573  ;;  %v571_v19 = vpop.xlane.xlu0 %570 }
 0x120   : > { %v1211_v22 = vmul.f32 0.020408163, %v574_v18  ;;  %v1210_v23 = vmul.f32 0.020408163, %v571_v19 }
 0x122   : > { %1468 = vst.msk [vmem:[%s1921_s15 + $0x208] sm:$0xff] %vm1402_vm1, %v1211_v22  ;;  %1467 = vst.msk [vmem:[%s1921_s15 + $0x200] sm:$0xff] %vm1402_vm1, %v1210_v23  ;;  %789 = vadd.xlane.f32.xlu1 %v788_v20  ;;  %786 = vadd.xlane.f32.xlu0 %v785_v21  ;;  %v836_v20 = vsel %vm376_vm0, %v273_v16, 0.0  ;;  %v833_v21 = vsel %vm376_vm0, %v272_v17, 0.0  ;;  %v289_v16 = vld [vmem:[%s1768_s12 + $0x548] sm:$0xff]  ;;  %v288_v17 = vld [vmem:[%s1768_s12 + $0x540] sm:$0xff] }
 0x123   : > { %v580_v26 = vpop.xlane.xlu1 %579  ;;  %v577_v27 = vpop.xlane.xlu0 %576 }
 0x124   : > { %v1213_v30 = vmul.f32 0.020408163, %v580_v26  ;;  %v1212_v31 = vmul.f32 0.020408163, %v577_v27 }
 0x126   : > { %1470 = vst.msk [vmem:[%s1921_s15 + $0x218] sm:$0xff] %vm1402_vm1, %v1213_v30  ;;  %1469 = vst.msk [vmem:[%s1921_s15 + $0x210] sm:$0xff] %vm1402_vm1, %v1212_v31  ;;  %795 = vadd.xlane.f32.xlu1 %v794_v28  ;;  %792 = vadd.xlane.f32.xlu0 %v791_v29  ;;  %v842_v28 = vsel %vm376_vm0, %v275_v24, 0.0  ;;  %v839_v29 = vsel %vm376_vm0, %v274_v25, 0.0  ;;  %v291_v24 = vld [vmem:[%s1768_s12 + $0x558] sm:$0xff]  ;;  %v290_v25 = vld [vmem:[%s1768_s12 + $0x550] sm:$0xff] }
 0x127   : > { %v586_v34 = vpop.xlane.xlu1 %585  ;;  %v583_v35 = vpop.xlane.xlu0 %582 }
 0x128   : > { %v1215_v38 = vmul.f32 0.020408163, %v586_v34  ;;  %v1214_v39 = vmul.f32 0.020408163, %v583_v35 }
 0x12a   : > { %1472 = vst.msk [vmem:[%s1921_s15 + $0x228] sm:$0xff] %vm1402_vm1, %v1215_v38  ;;  %1471 = vst.msk [vmem:[%s1921_s15 + $0x220] sm:$0xff] %vm1402_vm1, %v1214_v39  ;;  %801 = vadd.xlane.f32.xlu1 %v800_v36  ;;  %798 = vadd.xlane.f32.xlu0 %v797_v37  ;;  %v848_v36 = vsel %vm376_vm0, %v277_v32, 0.0  ;;  %v845_v37 = vsel %vm376_vm0, %v276_v33, 0.0  ;;  %v293_v32 = vld [vmem:[%s1768_s12 + $0x568] sm:$0xff]  ;;  %v292_v33 = vld [vmem:[%s1768_s12 + $0x560] sm:$0xff] }
 0x12b   : > { %v592_v42 = vpop.xlane.xlu1 %591  ;;  %v589_v43 = vpop.xlane.xlu0 %588 }
 0x12c   : > { %v1217_v46 = vmul.f32 0.020408163, %v592_v42  ;;  %v1216_v47 = vmul.f32 0.020408163, %v589_v43 }
 0x12e   : > { %1474 = vst.msk [vmem:[%s1921_s15 + $0x238] sm:$0xff] %vm1402_vm1, %v1217_v46  ;;  %1473 = vst.msk [vmem:[%s1921_s15 + $0x230] sm:$0xff] %vm1402_vm1, %v1216_v47  ;;  %807 = vadd.xlane.f32.xlu1 %v806_v44  ;;  %804 = vadd.xlane.f32.xlu0 %v803_v45  ;;  %v854_v44 = vsel %vm376_vm0, %v279_v40, 0.0  ;;  %v851_v45 = vsel %vm376_vm0, %v278_v41, 0.0  ;;  %v295_v40 = vld [vmem:[%s1768_s12 + $0x578] sm:$0xff]  ;;  %v294_v41 = vld [vmem:[%s1768_s12 + $0x570] sm:$0xff] }
 0x12f   : > { %v598_v50 = vpop.xlane.xlu1 %597  ;;  %v595_v51 = vpop.xlane.xlu0 %594 }
 0x130   : > { %v1219_v54 = vmul.f32 0.020408163, %v598_v50  ;;  %v1218_v55 = vmul.f32 0.020408163, %v595_v51 }
 0x132   : > { %1476 = vst.msk [vmem:[%s1921_s15 + $0x248] sm:$0xff] %vm1402_vm1, %v1219_v54  ;;  %1475 = vst.msk [vmem:[%s1921_s15 + $0x240] sm:$0xff] %vm1402_vm1, %v1218_v55  ;;  %813 = vadd.xlane.f32.xlu1 %v812_v52  ;;  %810 = vadd.xlane.f32.xlu0 %v809_v53  ;;  %v860_v52 = vsel %vm376_vm0, %v281_v48, 0.0  ;;  %v857_v53 = vsel %vm376_vm0, %v280_v49, 0.0  ;;  %v297_v48 = vld [vmem:[%s1768_s12 + $0x588] sm:$0xff]  ;;  %v296_v49 = vld [vmem:[%s1768_s12 + $0x580] sm:$0xff] }
 0x133   : > { %v604_v58 = vpop.xlane.xlu1 %603  ;;  %v601_v59 = vpop.xlane.xlu0 %600 }
 0x134   : > { %v1221_v62 = vmul.f32 0.020408163, %v604_v58  ;;  %v1220_v63 = vmul.f32 0.020408163, %v601_v59 }
 0x136   : > { %1478 = vst.msk [vmem:[%s1921_s15 + $0x258] sm:$0xff] %vm1402_vm1, %v1221_v62  ;;  %1477 = vst.msk [vmem:[%s1921_s15 + $0x250] sm:$0xff] %vm1402_vm1, %v1220_v63  ;;  %819 = vadd.xlane.f32.xlu1 %v818_v60  ;;  %816 = vadd.xlane.f32.xlu0 %v815_v61  ;;  %v866_v60 = vsel %vm376_vm0, %v283_v56, 0.0  ;;  %v863_v61 = vsel %vm376_vm0, %v282_v57, 0.0  ;;  %v299_v56 = vld [vmem:[%s1768_s12 + $0x598] sm:$0xff]  ;;  %v298_v57 = vld [vmem:[%s1768_s12 + $0x590] sm:$0xff] }
 0x137   : > { %v610_v2 = vpop.xlane.xlu1 %609  ;;  %v607_v3 = vpop.xlane.xlu0 %606 }
 0x138   : > { %v1223_v6 = vmul.f32 0.020408163, %v610_v2  ;;  %v1222_v7 = vmul.f32 0.020408163, %v607_v3 }
 0x13a   : > { %1480 = vst.msk [vmem:[%s1921_s15 + $0x268] sm:$0xff] %vm1402_vm1, %v1223_v6  ;;  %1479 = vst.msk [vmem:[%s1921_s15 + $0x260] sm:$0xff] %vm1402_vm1, %v1222_v7  ;;  %825 = vadd.xlane.f32.xlu1 %v824_v4  ;;  %822 = vadd.xlane.f32.xlu0 %v821_v5  ;;  %v872_v4 = vsel %vm376_vm0, %v285_v0, 0.0  ;;  %v869_v5 = vsel %vm376_vm0, %v284_v1, 0.0  ;;  %v301_v0 = vld [vmem:[%s1768_s12 + $0x5a8] sm:$0xff]  ;;  %v300_v1 = vld [vmem:[%s1768_s12 + $0x5a0] sm:$0xff] }
 0x13b   : > { %v616_v10 = vpop.xlane.xlu1 %615  ;;  %v613_v11 = vpop.xlane.xlu0 %612 }
 0x13c   : > { %v1225_v14 = vmul.f32 0.020408163, %v616_v10  ;;  %v1224_v15 = vmul.f32 0.020408163, %v613_v11 }
 0x13e   : > { %1482 = vst.msk [vmem:[%s1921_s15 + $0x278] sm:$0xff] %vm1402_vm1, %v1225_v14  ;;  %1481 = vst.msk [vmem:[%s1921_s15 + $0x270] sm:$0xff] %vm1402_vm1, %v1224_v15  ;;  %831 = vadd.xlane.f32.xlu1 %v830_v12  ;;  %828 = vadd.xlane.f32.xlu0 %v827_v13  ;;  %v878_v12 = vsel %vm376_vm0, %v287_v8, 0.0  ;;  %v875_v13 = vsel %vm376_vm0, %v286_v9, 0.0  ;;  %v303_v8 = vld [vmem:[%s1768_s12 + $0x5b8] sm:$0xff]  ;;  %v302_v9 = vld [vmem:[%s1768_s12 + $0x5b0] sm:$0xff] }
 0x13f   : > { %v622_v18 = vpop.xlane.xlu1 %621  ;;  %v619_v19 = vpop.xlane.xlu0 %618 }
 0x140   : > { %v1227_v22 = vmul.f32 0.020408163, %v622_v18  ;;  %v1226_v23 = vmul.f32 0.020408163, %v619_v19 }
 0x142   : > { %1484 = vst.msk [vmem:[%s1921_s15 + $0x288] sm:$0xff] %vm1402_vm1, %v1227_v22  ;;  %1483 = vst.msk [vmem:[%s1921_s15 + $0x280] sm:$0xff] %vm1402_vm1, %v1226_v23  ;;  %837 = vadd.xlane.f32.xlu1 %v836_v20  ;;  %834 = vadd.xlane.f32.xlu0 %v833_v21  ;;  %v884_v20 = vsel %vm376_vm0, %v289_v16, 0.0  ;;  %v881_v21 = vsel %vm376_vm0, %v288_v17, 0.0  ;;  %v305_v16 = vld [vmem:[%s1768_s12 + $0x5c8] sm:$0xff]  ;;  %v304_v17 = vld [vmem:[%s1768_s12 + $0x5c0] sm:$0xff] }
 0x143   : > { %v628_v26 = vpop.xlane.xlu1 %627  ;;  %v625_v27 = vpop.xlane.xlu0 %624 }
 0x144   : > { %v1229_v30 = vmul.f32 0.020408163, %v628_v26  ;;  %v1228_v31 = vmul.f32 0.020408163, %v625_v27 }
 0x146   : > { %1486 = vst.msk [vmem:[%s1921_s15 + $0x298] sm:$0xff] %vm1402_vm1, %v1229_v30  ;;  %1485 = vst.msk [vmem:[%s1921_s15 + $0x290] sm:$0xff] %vm1402_vm1, %v1228_v31  ;;  %843 = vadd.xlane.f32.xlu1 %v842_v28  ;;  %840 = vadd.xlane.f32.xlu0 %v839_v29  ;;  %v890_v28 = vsel %vm376_vm0, %v291_v24, 0.0  ;;  %v887_v29 = vsel %vm376_vm0, %v290_v25, 0.0  ;;  %v307_v24 = vld [vmem:[%s1768_s12 + $0x5d8] sm:$0xff]  ;;  %v306_v25 = vld [vmem:[%s1768_s12 + $0x5d0] sm:$0xff] }
 0x147   : > { %v634_v34 = vpop.xlane.xlu1 %633  ;;  %v631_v35 = vpop.xlane.xlu0 %630 }
 0x148   : > { %v1231_v38 = vmul.f32 0.020408163, %v634_v34  ;;  %v1230_v39 = vmul.f32 0.020408163, %v631_v35 }
 0x14a   : > { %1488 = vst.msk [vmem:[%s1921_s15 + $0x2a8] sm:$0xff] %vm1402_vm1, %v1231_v38  ;;  %1487 = vst.msk [vmem:[%s1921_s15 + $0x2a0] sm:$0xff] %vm1402_vm1, %v1230_v39  ;;  %849 = vadd.xlane.f32.xlu1 %v848_v36  ;;  %846 = vadd.xlane.f32.xlu0 %v845_v37  ;;  %v896_v36 = vsel %vm376_vm0, %v293_v32, 0.0  ;;  %v893_v37 = vsel %vm376_vm0, %v292_v33, 0.0  ;;  %v309_v32 = vld [vmem:[%s1768_s12 + $0x5e8] sm:$0xff]  ;;  %v308_v33 = vld [vmem:[%s1768_s12 + $0x5e0] sm:$0xff] }
 0x14b   : > { %v640_v42 = vpop.xlane.xlu1 %639  ;;  %v637_v43 = vpop.xlane.xlu0 %636 }
 0x14c   : > { %v1233_v46 = vmul.f32 0.020408163, %v640_v42  ;;  %v1232_v47 = vmul.f32 0.020408163, %v637_v43 }
 0x14e   : > { %1490 = vst.msk [vmem:[%s1921_s15 + $0x2b8] sm:$0xff] %vm1402_vm1, %v1233_v46  ;;  %1489 = vst.msk [vmem:[%s1921_s15 + $0x2b0] sm:$0xff] %vm1402_vm1, %v1232_v47  ;;  %855 = vadd.xlane.f32.xlu1 %v854_v44  ;;  %852 = vadd.xlane.f32.xlu0 %v851_v45  ;;  %v902_v44 = vsel %vm376_vm0, %v295_v40, 0.0  ;;  %v899_v45 = vsel %vm376_vm0, %v294_v41, 0.0  ;;  %v311_v40 = vld [vmem:[%s1768_s12 + $0x5f8] sm:$0xff]  ;;  %v310_v41 = vld [vmem:[%s1768_s12 + $0x5f0] sm:$0xff] }
 0x14f   : > { %v646_v50 = vpop.xlane.xlu1 %645  ;;  %v643_v51 = vpop.xlane.xlu0 %642 }
 0x150   : > { %v1235_v54 = vmul.f32 0.020408163, %v646_v50  ;;  %v1234_v55 = vmul.f32 0.020408163, %v643_v51 }
 0x152   : > { %1492 = vst.msk [vmem:[%s1921_s15 + $0x2c8] sm:$0xff] %vm1402_vm1, %v1235_v54  ;;  %1491 = vst.msk [vmem:[%s1921_s15 + $0x2c0] sm:$0xff] %vm1402_vm1, %v1234_v55  ;;  %861 = vadd.xlane.f32.xlu1 %v860_v52  ;;  %858 = vadd.xlane.f32.xlu0 %v857_v53  ;;  %v908_v52 = vsel %vm376_vm0, %v297_v48, 0.0  ;;  %v905_v53 = vsel %vm376_vm0, %v296_v49, 0.0  ;;  %v313_v48 = vld [vmem:[%s1768_s12 + $0x608] sm:$0xff]  ;;  %v312_v49 = vld [vmem:[%s1768_s12 + $0x600] sm:$0xff] }
 0x153   : > { %v652_v58 = vpop.xlane.xlu1 %651  ;;  %v649_v59 = vpop.xlane.xlu0 %648 }
 0x154   : > { %v1237_v62 = vmul.f32 0.020408163, %v652_v58  ;;  %v1236_v63 = vmul.f32 0.020408163, %v649_v59 }
 0x156   : > { %1494 = vst.msk [vmem:[%s1921_s15 + $0x2d8] sm:$0xff] %vm1402_vm1, %v1237_v62  ;;  %1493 = vst.msk [vmem:[%s1921_s15 + $0x2d0] sm:$0xff] %vm1402_vm1, %v1236_v63  ;;  %867 = vadd.xlane.f32.xlu1 %v866_v60  ;;  %864 = vadd.xlane.f32.xlu0 %v863_v61  ;;  %v914_v60 = vsel %vm376_vm0, %v299_v56, 0.0  ;;  %v911_v61 = vsel %vm376_vm0, %v298_v57, 0.0  ;;  %v315_v56 = vld [vmem:[%s1768_s12 + $0x618] sm:$0xff]  ;;  %v314_v57 = vld [vmem:[%s1768_s12 + $0x610] sm:$0xff] }
 0x157   : > { %v658_v2 = vpop.xlane.xlu1 %657  ;;  %v655_v3 = vpop.xlane.xlu0 %654 }
 0x158   : > { %v1239_v6 = vmul.f32 0.020408163, %v658_v2  ;;  %v1238_v7 = vmul.f32 0.020408163, %v655_v3 }
 0x15a   : > { %1496 = vst.msk [vmem:[%s1921_s15 + $0x2e8] sm:$0xff] %vm1402_vm1, %v1239_v6  ;;  %1495 = vst.msk [vmem:[%s1921_s15 + $0x2e0] sm:$0xff] %vm1402_vm1, %v1238_v7  ;;  %873 = vadd.xlane.f32.xlu1 %v872_v4  ;;  %870 = vadd.xlane.f32.xlu0 %v869_v5  ;;  %v920_v4 = vsel %vm376_vm0, %v301_v0, 0.0  ;;  %v917_v5 = vsel %vm376_vm0, %v300_v1, 0.0  ;;  %v317_v0 = vld [vmem:[%s1768_s12 + $0x628] sm:$0xff]  ;;  %v316_v1 = vld [vmem:[%s1768_s12 + $0x620] sm:$0xff] }
 0x15b   : > { %v664_v10 = vpop.xlane.xlu1 %663  ;;  %v661_v11 = vpop.xlane.xlu0 %660 }
 0x15c   : > { %v1241_v14 = vmul.f32 0.020408163, %v664_v10  ;;  %v1240_v15 = vmul.f32 0.020408163, %v661_v11 }
 0x15e   : > { %1498 = vst.msk [vmem:[%s1921_s15 + $0x2f8] sm:$0xff] %vm1402_vm1, %v1241_v14  ;;  %1497 = vst.msk [vmem:[%s1921_s15 + $0x2f0] sm:$0xff] %vm1402_vm1, %v1240_v15  ;;  %879 = vadd.xlane.f32.xlu1 %v878_v12  ;;  %876 = vadd.xlane.f32.xlu0 %v875_v13  ;;  %v926_v12 = vsel %vm376_vm0, %v303_v8, 0.0  ;;  %v923_v13 = vsel %vm376_vm0, %v302_v9, 0.0  ;;  %v319_v8 = vld [vmem:[%s1768_s12 + $0x638] sm:$0xff]  ;;  %v318_v9 = vld [vmem:[%s1768_s12 + $0x630] sm:$0xff] }
 0x15f   : > { %v670_v18 = vpop.xlane.xlu1 %669  ;;  %v667_v19 = vpop.xlane.xlu0 %666 }
 0x160   : > { %v1243_v22 = vmul.f32 0.020408163, %v670_v18  ;;  %v1242_v23 = vmul.f32 0.020408163, %v667_v19 }
 0x162   : > { %1500 = vst.msk [vmem:[%s1921_s15 + $0x308] sm:$0xff] %vm1402_vm1, %v1243_v22  ;;  %1499 = vst.msk [vmem:[%s1921_s15 + $0x300] sm:$0xff] %vm1402_vm1, %v1242_v23  ;;  %885 = vadd.xlane.f32.xlu1 %v884_v20  ;;  %882 = vadd.xlane.f32.xlu0 %v881_v21  ;;  %v932_v20 = vsel %vm376_vm0, %v305_v16, 0.0  ;;  %v929_v21 = vsel %vm376_vm0, %v304_v17, 0.0  ;;  %v321_v16 = vld [vmem:[%s1768_s12 + $0x648] sm:$0xff]  ;;  %v320_v17 = vld [vmem:[%s1768_s12 + $0x640] sm:$0xff] }
 0x163   : > { %v676_v26 = vpop.xlane.xlu1 %675  ;;  %v673_v27 = vpop.xlane.xlu0 %672 }
 0x164   : > { %v1245_v30 = vmul.f32 0.020408163, %v676_v26  ;;  %v1244_v31 = vmul.f32 0.020408163, %v673_v27 }
 0x166   : > { %1502 = vst.msk [vmem:[%s1921_s15 + $0x318] sm:$0xff] %vm1402_vm1, %v1245_v30  ;;  %1501 = vst.msk [vmem:[%s1921_s15 + $0x310] sm:$0xff] %vm1402_vm1, %v1244_v31  ;;  %891 = vadd.xlane.f32.xlu1 %v890_v28  ;;  %888 = vadd.xlane.f32.xlu0 %v887_v29  ;;  %v938_v28 = vsel %vm376_vm0, %v307_v24, 0.0  ;;  %v935_v29 = vsel %vm376_vm0, %v306_v25, 0.0  ;;  %v323_v24 = vld [vmem:[%s1768_s12 + $0x658] sm:$0xff]  ;;  %v322_v25 = vld [vmem:[%s1768_s12 + $0x650] sm:$0xff] }
 0x167   : > { %v682_v34 = vpop.xlane.xlu1 %681  ;;  %v679_v35 = vpop.xlane.xlu0 %678 }
 0x168   : > { %v1247_v38 = vmul.f32 0.020408163, %v682_v34  ;;  %v1246_v39 = vmul.f32 0.020408163, %v679_v35 }
 0x16a   : > { %1504 = vst.msk [vmem:[%s1921_s15 + $0x328] sm:$0xff] %vm1402_vm1, %v1247_v38  ;;  %1503 = vst.msk [vmem:[%s1921_s15 + $0x320] sm:$0xff] %vm1402_vm1, %v1246_v39  ;;  %897 = vadd.xlane.f32.xlu1 %v896_v36  ;;  %894 = vadd.xlane.f32.xlu0 %v893_v37  ;;  %v944_v36 = vsel %vm376_vm0, %v309_v32, 0.0  ;;  %v941_v37 = vsel %vm376_vm0, %v308_v33, 0.0  ;;  %v325_v32 = vld [vmem:[%s1768_s12 + $0x668] sm:$0xff]  ;;  %v324_v33 = vld [vmem:[%s1768_s12 + $0x660] sm:$0xff] }
 0x16b   : > { %v688_v42 = vpop.xlane.xlu1 %687  ;;  %v685_v43 = vpop.xlane.xlu0 %684 }
 0x16c   : > { %v1249_v46 = vmul.f32 0.020408163, %v688_v42  ;;  %v1248_v47 = vmul.f32 0.020408163, %v685_v43 }
 0x16e   : > { %1506 = vst.msk [vmem:[%s1921_s15 + $0x338] sm:$0xff] %vm1402_vm1, %v1249_v46  ;;  %1505 = vst.msk [vmem:[%s1921_s15 + $0x330] sm:$0xff] %vm1402_vm1, %v1248_v47  ;;  %903 = vadd.xlane.f32.xlu1 %v902_v44  ;;  %900 = vadd.xlane.f32.xlu0 %v899_v45  ;;  %v950_v44 = vsel %vm376_vm0, %v311_v40, 0.0  ;;  %v947_v45 = vsel %vm376_vm0, %v310_v41, 0.0  ;;  %v327_v40 = vld [vmem:[%s1768_s12 + $0x678] sm:$0xff]  ;;  %v326_v41 = vld [vmem:[%s1768_s12 + $0x670] sm:$0xff] }
 0x16f   : > { %v694_v50 = vpop.xlane.xlu1 %693  ;;  %v691_v51 = vpop.xlane.xlu0 %690 }
 0x170   : > { %v1251_v54 = vmul.f32 0.020408163, %v694_v50  ;;  %v1250_v55 = vmul.f32 0.020408163, %v691_v51 }
 0x172   : > { %1508 = vst.msk [vmem:[%s1921_s15 + $0x348] sm:$0xff] %vm1402_vm1, %v1251_v54  ;;  %1507 = vst.msk [vmem:[%s1921_s15 + $0x340] sm:$0xff] %vm1402_vm1, %v1250_v55  ;;  %909 = vadd.xlane.f32.xlu1 %v908_v52  ;;  %906 = vadd.xlane.f32.xlu0 %v905_v53  ;;  %v956_v52 = vsel %vm376_vm0, %v313_v48, 0.0  ;;  %v953_v53 = vsel %vm376_vm0, %v312_v49, 0.0  ;;  %v329_v48 = vld [vmem:[%s1768_s12 + $0x688] sm:$0xff]  ;;  %v328_v49 = vld [vmem:[%s1768_s12 + $0x680] sm:$0xff] }
 0x173   : > { %v700_v58 = vpop.xlane.xlu1 %699  ;;  %v697_v59 = vpop.xlane.xlu0 %696 }
 0x174   : > { %v1253_v62 = vmul.f32 0.020408163, %v700_v58  ;;  %v1252_v63 = vmul.f32 0.020408163, %v697_v59 }
 0x176   : > { %1510 = vst.msk [vmem:[%s1921_s15 + $0x358] sm:$0xff] %vm1402_vm1, %v1253_v62  ;;  %1509 = vst.msk [vmem:[%s1921_s15 + $0x350] sm:$0xff] %vm1402_vm1, %v1252_v63  ;;  %915 = vadd.xlane.f32.xlu1 %v914_v60  ;;  %912 = vadd.xlane.f32.xlu0 %v911_v61  ;;  %v962_v60 = vsel %vm376_vm0, %v315_v56, 0.0  ;;  %v959_v61 = vsel %vm376_vm0, %v314_v57, 0.0  ;;  %v331_v56 = vld [vmem:[%s1768_s12 + $0x698] sm:$0xff]  ;;  %v330_v57 = vld [vmem:[%s1768_s12 + $0x690] sm:$0xff] }
 0x177   : > { %v706_v2 = vpop.xlane.xlu1 %705  ;;  %v703_v3 = vpop.xlane.xlu0 %702 }
 0x178   : > { %v1255_v6 = vmul.f32 0.020408163, %v706_v2  ;;  %v1254_v7 = vmul.f32 0.020408163, %v703_v3 }
 0x17a   : > { %1512 = vst.msk [vmem:[%s1921_s15 + $0x368] sm:$0xff] %vm1402_vm1, %v1255_v6  ;;  %1511 = vst.msk [vmem:[%s1921_s15 + $0x360] sm:$0xff] %vm1402_vm1, %v1254_v7  ;;  %921 = vadd.xlane.f32.xlu1 %v920_v4  ;;  %918 = vadd.xlane.f32.xlu0 %v917_v5  ;;  %v968_v4 = vsel %vm376_vm0, %v317_v0, 0.0  ;;  %v965_v5 = vsel %vm376_vm0, %v316_v1, 0.0  ;;  %v333_v0 = vld [vmem:[%s1768_s12 + $0x6a8] sm:$0xff]  ;;  %v332_v1 = vld [vmem:[%s1768_s12 + $0x6a0] sm:$0xff] }
 0x17b   : > { %v712_v10 = vpop.xlane.xlu1 %711  ;;  %v709_v11 = vpop.xlane.xlu0 %708 }
 0x17c   : > { %v1257_v14 = vmul.f32 0.020408163, %v712_v10  ;;  %v1256_v15 = vmul.f32 0.020408163, %v709_v11 }
 0x17e   : > { %1514 = vst.msk [vmem:[%s1921_s15 + $0x378] sm:$0xff] %vm1402_vm1, %v1257_v14  ;;  %1513 = vst.msk [vmem:[%s1921_s15 + $0x370] sm:$0xff] %vm1402_vm1, %v1256_v15  ;;  %927 = vadd.xlane.f32.xlu1 %v926_v12  ;;  %924 = vadd.xlane.f32.xlu0 %v923_v13  ;;  %v974_v12 = vsel %vm376_vm0, %v319_v8, 0.0  ;;  %v971_v13 = vsel %vm376_vm0, %v318_v9, 0.0  ;;  %v335_v8 = vld [vmem:[%s1768_s12 + $0x6b8] sm:$0xff]  ;;  %v334_v9 = vld [vmem:[%s1768_s12 + $0x6b0] sm:$0xff] }
 0x17f   : > { %v718_v18 = vpop.xlane.xlu1 %717  ;;  %v715_v19 = vpop.xlane.xlu0 %714 }
 0x180   : > { %v1259_v22 = vmul.f32 0.020408163, %v718_v18  ;;  %v1258_v23 = vmul.f32 0.020408163, %v715_v19 }
 0x182   : > { %1516 = vst.msk [vmem:[%s1921_s15 + $0x388] sm:$0xff] %vm1402_vm1, %v1259_v22  ;;  %1515 = vst.msk [vmem:[%s1921_s15 + $0x380] sm:$0xff] %vm1402_vm1, %v1258_v23  ;;  %933 = vadd.xlane.f32.xlu1 %v932_v20  ;;  %930 = vadd.xlane.f32.xlu0 %v929_v21  ;;  %v980_v20 = vsel %vm376_vm0, %v321_v16, 0.0  ;;  %v977_v21 = vsel %vm376_vm0, %v320_v17, 0.0  ;;  %v337_v16 = vld [vmem:[%s1768_s12 + $0x6c8] sm:$0xff]  ;;  %v336_v17 = vld [vmem:[%s1768_s12 + $0x6c0] sm:$0xff] }
 0x183   : > { %v724_v26 = vpop.xlane.xlu1 %723  ;;  %v721_v27 = vpop.xlane.xlu0 %720 }
 0x184   : > { %v1261_v30 = vmul.f32 0.020408163, %v724_v26  ;;  %v1260_v31 = vmul.f32 0.020408163, %v721_v27 }
 0x186   : > { %1518 = vst.msk [vmem:[%s1921_s15 + $0x398] sm:$0xff] %vm1402_vm1, %v1261_v30  ;;  %1517 = vst.msk [vmem:[%s1921_s15 + $0x390] sm:$0xff] %vm1402_vm1, %v1260_v31  ;;  %939 = vadd.xlane.f32.xlu1 %v938_v28  ;;  %936 = vadd.xlane.f32.xlu0 %v935_v29  ;;  %v986_v28 = vsel %vm376_vm0, %v323_v24, 0.0  ;;  %v983_v29 = vsel %vm376_vm0, %v322_v25, 0.0  ;;  %v339_v24 = vld [vmem:[%s1768_s12 + $0x6d8] sm:$0xff]  ;;  %v338_v25 = vld [vmem:[%s1768_s12 + $0x6d0] sm:$0xff] }
 0x187   : > { %v730_v34 = vpop.xlane.xlu1 %729  ;;  %v727_v35 = vpop.xlane.xlu0 %726 }
 0x188   : > { %v1263_v38 = vmul.f32 0.020408163, %v730_v34  ;;  %v1262_v39 = vmul.f32 0.020408163, %v727_v35 }
 0x18a   : > { %1520 = vst.msk [vmem:[%s1921_s15 + $0x3a8] sm:$0xff] %vm1402_vm1, %v1263_v38  ;;  %1519 = vst.msk [vmem:[%s1921_s15 + $0x3a0] sm:$0xff] %vm1402_vm1, %v1262_v39  ;;  %945 = vadd.xlane.f32.xlu1 %v944_v36  ;;  %942 = vadd.xlane.f32.xlu0 %v941_v37  ;;  %v992_v36 = vsel %vm376_vm0, %v325_v32, 0.0  ;;  %v989_v37 = vsel %vm376_vm0, %v324_v33, 0.0  ;;  %v341_v32 = vld [vmem:[%s1768_s12 + $0x6e8] sm:$0xff]  ;;  %v340_v33 = vld [vmem:[%s1768_s12 + $0x6e0] sm:$0xff] }
 0x18b   : > { %v736_v42 = vpop.xlane.xlu1 %735  ;;  %v733_v43 = vpop.xlane.xlu0 %732 }
 0x18c   : > { %v1265_v46 = vmul.f32 0.020408163, %v736_v42  ;;  %v1264_v47 = vmul.f32 0.020408163, %v733_v43 }
 0x18e   : > { %1522 = vst.msk [vmem:[%s1921_s15 + $0x3b8] sm:$0xff] %vm1402_vm1, %v1265_v46  ;;  %1521 = vst.msk [vmem:[%s1921_s15 + $0x3b0] sm:$0xff] %vm1402_vm1, %v1264_v47  ;;  %951 = vadd.xlane.f32.xlu1 %v950_v44  ;;  %948 = vadd.xlane.f32.xlu0 %v947_v45  ;;  %v998_v44 = vsel %vm376_vm0, %v327_v40, 0.0  ;;  %v995_v45 = vsel %vm376_vm0, %v326_v41, 0.0  ;;  %v343_v40 = vld [vmem:[%s1768_s12 + $0x6f8] sm:$0xff]  ;;  %v342_v41 = vld [vmem:[%s1768_s12 + $0x6f0] sm:$0xff] }
 0x18f   : > { %v742_v50 = vpop.xlane.xlu1 %741  ;;  %v739_v51 = vpop.xlane.xlu0 %738 }
 0x190   : > { %v1267_v54 = vmul.f32 0.020408163, %v742_v50  ;;  %v1266_v55 = vmul.f32 0.020408163, %v739_v51 }
 0x192   : > { %1524 = vst.msk [vmem:[%s1921_s15 + $0x3c8] sm:$0xff] %vm1402_vm1, %v1267_v54  ;;  %1523 = vst.msk [vmem:[%s1921_s15 + $0x3c0] sm:$0xff] %vm1402_vm1, %v1266_v55  ;;  %957 = vadd.xlane.f32.xlu1 %v956_v52  ;;  %954 = vadd.xlane.f32.xlu0 %v953_v53  ;;  %v1004_v52 = vsel %vm376_vm0, %v329_v48, 0.0  ;;  %v1001_v53 = vsel %vm376_vm0, %v328_v49, 0.0  ;;  %v345_v48 = vld [vmem:[%s1768_s12 + $0x708] sm:$0xff]  ;;  %v344_v49 = vld [vmem:[%s1768_s12 + $0x700] sm:$0xff] }
 0x193   : > { %v748_v58 = vpop.xlane.xlu1 %747  ;;  %v745_v59 = vpop.xlane.xlu0 %744 }
 0x194   : > { %v1269_v62 = vmul.f32 0.020408163, %v748_v58  ;;  %v1268_v63 = vmul.f32 0.020408163, %v745_v59 }
 0x196   : > { %1526 = vst.msk [vmem:[%s1921_s15 + $0x3d8] sm:$0xff] %vm1402_vm1, %v1269_v62  ;;  %1525 = vst.msk [vmem:[%s1921_s15 + $0x3d0] sm:$0xff] %vm1402_vm1, %v1268_v63  ;;  %963 = vadd.xlane.f32.xlu1 %v962_v60  ;;  %960 = vadd.xlane.f32.xlu0 %v959_v61  ;;  %v1010_v60 = vsel %vm376_vm0, %v331_v56, 0.0  ;;  %v1007_v61 = vsel %vm376_vm0, %v330_v57, 0.0  ;;  %v347_v56 = vld [vmem:[%s1768_s12 + $0x718] sm:$0xff]  ;;  %v346_v57 = vld [vmem:[%s1768_s12 + $0x710] sm:$0xff] }
 0x197   : > { %v754_v2 = vpop.xlane.xlu1 %753  ;;  %v751_v3 = vpop.xlane.xlu0 %750 }
 0x198   : > { %v1271_v6 = vmul.f32 0.020408163, %v754_v2  ;;  %v1270_v7 = vmul.f32 0.020408163, %v751_v3 }
 0x19a   : > { %1528 = vst.msk [vmem:[%s1921_s15 + $0x3e8] sm:$0xff] %vm1402_vm1, %v1271_v6  ;;  %1527 = vst.msk [vmem:[%s1921_s15 + $0x3e0] sm:$0xff] %vm1402_vm1, %v1270_v7  ;;  %969 = vadd.xlane.f32.xlu1 %v968_v4  ;;  %966 = vadd.xlane.f32.xlu0 %v965_v5  ;;  %v1016_v4 = vsel %vm376_vm0, %v333_v0, 0.0  ;;  %v1013_v5 = vsel %vm376_vm0, %v332_v1, 0.0  ;;  %v349_v0 = vld [vmem:[%s1768_s12 + $0x728] sm:$0xff]  ;;  %v348_v1 = vld [vmem:[%s1768_s12 + $0x720] sm:$0xff] }
 0x19b   : > { %v760_v10 = vpop.xlane.xlu1 %759  ;;  %v757_v11 = vpop.xlane.xlu0 %756 }
 0x19c   : > { %v1273_v14 = vmul.f32 0.020408163, %v760_v10  ;;  %v1272_v15 = vmul.f32 0.020408163, %v757_v11 }
 0x19e   : > { %1530 = vst.msk [vmem:[%s1921_s15 + $0x3f8] sm:$0xff] %vm1402_vm1, %v1273_v14  ;;  %1529 = vst.msk [vmem:[%s1921_s15 + $0x3f0] sm:$0xff] %vm1402_vm1, %v1272_v15  ;;  %975 = vadd.xlane.f32.xlu1 %v974_v12  ;;  %972 = vadd.xlane.f32.xlu0 %v971_v13  ;;  %v1022_v12 = vsel %vm376_vm0, %v335_v8, 0.0  ;;  %v1019_v13 = vsel %vm376_vm0, %v334_v9, 0.0  ;;  %v351_v8 = vld [vmem:[%s1768_s12 + $0x738] sm:$0xff]  ;;  %v350_v9 = vld [vmem:[%s1768_s12 + $0x730] sm:$0xff] }
 0x19f   : > { %v766_v18 = vpop.xlane.xlu1 %765  ;;  %v763_v19 = vpop.xlane.xlu0 %762 }
 0x1a0   : > { %v1275_v22 = vmul.f32 0.020408163, %v766_v18  ;;  %v1274_v23 = vmul.f32 0.020408163, %v763_v19 }
 0x1a2   : > { %1532 = vst.msk [vmem:[%s1921_s15 + $0x408] sm:$0xff] %vm1402_vm1, %v1275_v22  ;;  %1531 = vst.msk [vmem:[%s1921_s15 + $0x400] sm:$0xff] %vm1402_vm1, %v1274_v23  ;;  %981 = vadd.xlane.f32.xlu1 %v980_v20  ;;  %978 = vadd.xlane.f32.xlu0 %v977_v21  ;;  %v1028_v20 = vsel %vm376_vm0, %v337_v16, 0.0  ;;  %v1025_v21 = vsel %vm376_vm0, %v336_v17, 0.0  ;;  %v353_v16 = vld [vmem:[%s1768_s12 + $0x748] sm:$0xff]  ;;  %v352_v17 = vld [vmem:[%s1768_s12 + $0x740] sm:$0xff] }
 0x1a3   : > { %v772_v26 = vpop.xlane.xlu1 %771  ;;  %v769_v27 = vpop.xlane.xlu0 %768 }
 0x1a4   : > { %v1277_v30 = vmul.f32 0.020408163, %v772_v26  ;;  %v1276_v31 = vmul.f32 0.020408163, %v769_v27 }
 0x1a6   : > { %1534 = vst.msk [vmem:[%s1921_s15 + $0x418] sm:$0xff] %vm1402_vm1, %v1277_v30  ;;  %1533 = vst.msk [vmem:[%s1921_s15 + $0x410] sm:$0xff] %vm1402_vm1, %v1276_v31  ;;  %987 = vadd.xlane.f32.xlu1 %v986_v28  ;;  %984 = vadd.xlane.f32.xlu0 %v983_v29  ;;  %v1034_v28 = vsel %vm376_vm0, %v339_v24, 0.0  ;;  %v1031_v29 = vsel %vm376_vm0, %v338_v25, 0.0  ;;  %v355_v24 = vld [vmem:[%s1768_s12 + $0x758] sm:$0xff]  ;;  %v354_v25 = vld [vmem:[%s1768_s12 + $0x750] sm:$0xff] }
 0x1a7   : > { %v778_v34 = vpop.xlane.xlu1 %777  ;;  %v775_v35 = vpop.xlane.xlu0 %774 }
 0x1a8   : > { %v1279_v38 = vmul.f32 0.020408163, %v778_v34  ;;  %v1278_v39 = vmul.f32 0.020408163, %v775_v35 }
 0x1aa   : > { %1536 = vst.msk [vmem:[%s1921_s15 + $0x428] sm:$0xff] %vm1402_vm1, %v1279_v38  ;;  %1535 = vst.msk [vmem:[%s1921_s15 + $0x420] sm:$0xff] %vm1402_vm1, %v1278_v39  ;;  %993 = vadd.xlane.f32.xlu1 %v992_v36  ;;  %990 = vadd.xlane.f32.xlu0 %v989_v37  ;;  %v1040_v36 = vsel %vm376_vm0, %v341_v32, 0.0  ;;  %v1037_v37 = vsel %vm376_vm0, %v340_v33, 0.0  ;;  %v357_v32 = vld [vmem:[%s1768_s12 + $0x768] sm:$0xff]  ;;  %v356_v33 = vld [vmem:[%s1768_s12 + $0x760] sm:$0xff] }
 0x1ab   : > { %v784_v42 = vpop.xlane.xlu1 %783  ;;  %v781_v43 = vpop.xlane.xlu0 %780 }
 0x1ac   : > { %v1281_v46 = vmul.f32 0.020408163, %v784_v42  ;;  %v1280_v47 = vmul.f32 0.020408163, %v781_v43 }
 0x1ae   : > { %1538 = vst.msk [vmem:[%s1921_s15 + $0x438] sm:$0xff] %vm1402_vm1, %v1281_v46  ;;  %1537 = vst.msk [vmem:[%s1921_s15 + $0x430] sm:$0xff] %vm1402_vm1, %v1280_v47  ;;  %999 = vadd.xlane.f32.xlu1 %v998_v44  ;;  %996 = vadd.xlane.f32.xlu0 %v995_v45  ;;  %v1046_v44 = vsel %vm376_vm0, %v343_v40, 0.0  ;;  %v1043_v45 = vsel %vm376_vm0, %v342_v41, 0.0  ;;  %v359_v40 = vld [vmem:[%s1768_s12 + $0x778] sm:$0xff]  ;;  %v358_v41 = vld [vmem:[%s1768_s12 + $0x770] sm:$0xff] }
 0x1af   : > { %v790_v50 = vpop.xlane.xlu1 %789  ;;  %v787_v51 = vpop.xlane.xlu0 %786 }
 0x1b0   : > { %v1283_v54 = vmul.f32 0.020408163, %v790_v50  ;;  %v1282_v55 = vmul.f32 0.020408163, %v787_v51 }
 0x1b2   : > { %1540 = vst.msk [vmem:[%s1921_s15 + $0x448] sm:$0xff] %vm1402_vm1, %v1283_v54  ;;  %1539 = vst.msk [vmem:[%s1921_s15 + $0x440] sm:$0xff] %vm1402_vm1, %v1282_v55  ;;  %1005 = vadd.xlane.f32.xlu1 %v1004_v52  ;;  %1002 = vadd.xlane.f32.xlu0 %v1001_v53  ;;  %v1052_v52 = vsel %vm376_vm0, %v345_v48, 0.0  ;;  %v1049_v53 = vsel %vm376_vm0, %v344_v49, 0.0  ;;  %v361_v48 = vld [vmem:[%s1768_s12 + $0x788] sm:$0xff]  ;;  %v360_v49 = vld [vmem:[%s1768_s12 + $0x780] sm:$0xff] }
 0x1b3   : > { %v796_v58 = vpop.xlane.xlu1 %795  ;;  %v793_v59 = vpop.xlane.xlu0 %792 }
 0x1b4   : > { %v1285_v62 = vmul.f32 0.020408163, %v796_v58  ;;  %v1284_v63 = vmul.f32 0.020408163, %v793_v59 }
 0x1b6   : > { %1542 = vst.msk [vmem:[%s1921_s15 + $0x458] sm:$0xff] %vm1402_vm1, %v1285_v62  ;;  %1541 = vst.msk [vmem:[%s1921_s15 + $0x450] sm:$0xff] %vm1402_vm1, %v1284_v63  ;;  %1011 = vadd.xlane.f32.xlu1 %v1010_v60  ;;  %1008 = vadd.xlane.f32.xlu0 %v1007_v61  ;;  %v1058_v60 = vsel %vm376_vm0, %v347_v56, 0.0  ;;  %v1055_v61 = vsel %vm376_vm0, %v346_v57, 0.0  ;;  %v363_v56 = vld [vmem:[%s1768_s12 + $0x798] sm:$0xff]  ;;  %v362_v57 = vld [vmem:[%s1768_s12 + $0x790] sm:$0xff] }
 0x1b7   : > { %v802_v2 = vpop.xlane.xlu1 %801  ;;  %v799_v3 = vpop.xlane.xlu0 %798 }
 0x1b8   : > { %v1287_v6 = vmul.f32 0.020408163, %v802_v2  ;;  %v1286_v7 = vmul.f32 0.020408163, %v799_v3 }
 0x1ba   : > { %1544 = vst.msk [vmem:[%s1921_s15 + $0x468] sm:$0xff] %vm1402_vm1, %v1287_v6  ;;  %1543 = vst.msk [vmem:[%s1921_s15 + $0x460] sm:$0xff] %vm1402_vm1, %v1286_v7  ;;  %1017 = vadd.xlane.f32.xlu1 %v1016_v4  ;;  %1014 = vadd.xlane.f32.xlu0 %v1013_v5  ;;  %v1064_v4 = vsel %vm376_vm0, %v349_v0, 0.0  ;;  %v1061_v5 = vsel %vm376_vm0, %v348_v1, 0.0  ;;  %v365_v0 = vld [vmem:[%s1768_s12 + $0x7a8] sm:$0xff]  ;;  %v364_v1 = vld [vmem:[%s1768_s12 + $0x7a0] sm:$0xff] }
 0x1bb   : > { %v808_v10 = vpop.xlane.xlu1 %807  ;;  %v805_v11 = vpop.xlane.xlu0 %804 }
 0x1bc   : > { %v1289_v14 = vmul.f32 0.020408163, %v808_v10  ;;  %v1288_v15 = vmul.f32 0.020408163, %v805_v11 }
 0x1be   : > { %1546 = vst.msk [vmem:[%s1921_s15 + $0x478] sm:$0xff] %vm1402_vm1, %v1289_v14  ;;  %1545 = vst.msk [vmem:[%s1921_s15 + $0x470] sm:$0xff] %vm1402_vm1, %v1288_v15  ;;  %1023 = vadd.xlane.f32.xlu1 %v1022_v12  ;;  %1020 = vadd.xlane.f32.xlu0 %v1019_v13  ;;  %v1070_v12 = vsel %vm376_vm0, %v351_v8, 0.0  ;;  %v1067_v13 = vsel %vm376_vm0, %v350_v9, 0.0  ;;  %v367_v8 = vld [vmem:[%s1768_s12 + $0x7b8] sm:$0xff]  ;;  %v366_v9 = vld [vmem:[%s1768_s12 + $0x7b0] sm:$0xff] }
 0x1bf   : > { %v814_v18 = vpop.xlane.xlu1 %813  ;;  %v811_v19 = vpop.xlane.xlu0 %810 }
 0x1c0   : > { %v1291_v22 = vmul.f32 0.020408163, %v814_v18  ;;  %v1290_v23 = vmul.f32 0.020408163, %v811_v19 }
 0x1c2   : > { %1548 = vst.msk [vmem:[%s1921_s15 + $0x488] sm:$0xff] %vm1402_vm1, %v1291_v22  ;;  %1547 = vst.msk [vmem:[%s1921_s15 + $0x480] sm:$0xff] %vm1402_vm1, %v1290_v23  ;;  %1029 = vadd.xlane.f32.xlu1 %v1028_v20  ;;  %1026 = vadd.xlane.f32.xlu0 %v1025_v21  ;;  %v1076_v20 = vsel %vm376_vm0, %v353_v16, 0.0  ;;  %v1073_v21 = vsel %vm376_vm0, %v352_v17, 0.0  ;;  %v369_v16 = vld [vmem:[%s1768_s12 + $0x7c8] sm:$0xff]  ;;  %v368_v17 = vld [vmem:[%s1768_s12 + $0x7c0] sm:$0xff] }
 0x1c3   : > { %v820_v26 = vpop.xlane.xlu1 %819  ;;  %v817_v27 = vpop.xlane.xlu0 %816 }
 0x1c4   : > { %v1293_v30 = vmul.f32 0.020408163, %v820_v26  ;;  %v1292_v31 = vmul.f32 0.020408163, %v817_v27 }
 0x1c6   : > { %1550 = vst.msk [vmem:[%s1921_s15 + $0x498] sm:$0xff] %vm1402_vm1, %v1293_v30  ;;  %1549 = vst.msk [vmem:[%s1921_s15 + $0x490] sm:$0xff] %vm1402_vm1, %v1292_v31  ;;  %1035 = vadd.xlane.f32.xlu1 %v1034_v28  ;;  %1032 = vadd.xlane.f32.xlu0 %v1031_v29  ;;  %v1082_v28 = vsel %vm376_vm0, %v355_v24, 0.0  ;;  %v1079_v29 = vsel %vm376_vm0, %v354_v25, 0.0  ;;  %v371_v24 = vld [vmem:[%s1768_s12 + $0x7d8] sm:$0xff]  ;;  %v370_v25 = vld [vmem:[%s1768_s12 + $0x7d0] sm:$0xff] }
 0x1c7   : > { %v826_v34 = vpop.xlane.xlu1 %825  ;;  %v823_v35 = vpop.xlane.xlu0 %822 }
 0x1c8   : > { %v1295_v38 = vmul.f32 0.020408163, %v826_v34  ;;  %v1294_v39 = vmul.f32 0.020408163, %v823_v35 }
 0x1ca   : > { %1552 = vst.msk [vmem:[%s1921_s15 + $0x4a8] sm:$0xff] %vm1402_vm1, %v1295_v38  ;;  %1551 = vst.msk [vmem:[%s1921_s15 + $0x4a0] sm:$0xff] %vm1402_vm1, %v1294_v39  ;;  %1041 = vadd.xlane.f32.xlu1 %v1040_v36  ;;  %1038 = vadd.xlane.f32.xlu0 %v1037_v37  ;;  %v1088_v36 = vsel %vm376_vm0, %v357_v32, 0.0  ;;  %v1085_v37 = vsel %vm376_vm0, %v356_v33, 0.0  ;;  %v373_v32 = vld [vmem:[%s1768_s12 + $0x7e8] sm:$0xff]  ;;  %v372_v33 = vld [vmem:[%s1768_s12 + $0x7e0] sm:$0xff] }
 0x1cb   : > { %v832_v42 = vpop.xlane.xlu1 %831  ;;  %v829_v43 = vpop.xlane.xlu0 %828 }
 0x1cc   : > { %v1297_v46 = vmul.f32 0.020408163, %v832_v42  ;;  %v1296_v47 = vmul.f32 0.020408163, %v829_v43 }
 0x1ce   : > { %1554 = vst.msk [vmem:[%s1921_s15 + $0x4b8] sm:$0xff] %vm1402_vm1, %v1297_v46  ;;  %1553 = vst.msk [vmem:[%s1921_s15 + $0x4b0] sm:$0xff] %vm1402_vm1, %v1296_v47  ;;  %1047 = vadd.xlane.f32.xlu1 %v1046_v44  ;;  %1044 = vadd.xlane.f32.xlu0 %v1043_v45  ;;  %v1094_v44 = vsel %vm376_vm0, %v359_v40, 0.0  ;;  %v1091_v45 = vsel %vm376_vm0, %v358_v41, 0.0  ;;  %v375_v40 = vld [vmem:[%s1768_s12 + $0x7f8] sm:$0xff]  ;;  %v374_v41 = vld [vmem:[%s1768_s12 + $0x7f0] sm:$0xff] }
 0x1cf   : > { %v838_v50 = vpop.xlane.xlu1 %837  ;;  %v835_v51 = vpop.xlane.xlu0 %834 }
 0x1d0   : > { %v1299_v54 = vmul.f32 0.020408163, %v838_v50  ;;  %v1298_v55 = vmul.f32 0.020408163, %v835_v51 }
 0x1d2   : > { %1556 = vst.msk [vmem:[%s1921_s15 + $0x4c8] sm:$0xff] %vm1402_vm1, %v1299_v54  ;;  %1555 = vst.msk [vmem:[%s1921_s15 + $0x4c0] sm:$0xff] %vm1402_vm1, %v1298_v55  ;;  %1053 = vadd.xlane.f32.xlu1 %v1052_v52  ;;  %1050 = vadd.xlane.f32.xlu0 %v1049_v53  ;;  %v1100_v52 = vsel %vm376_vm0, %v361_v48, 0.0  ;;  %v1097_v53 = vsel %vm376_vm0, %v360_v49, 0.0 }
 0x1d3   : > { %v844_v58 = vpop.xlane.xlu1 %843  ;;  %v841_v59 = vpop.xlane.xlu0 %840 }
 0x1d4   : > { %v1301_v62 = vmul.f32 0.020408163, %v844_v58  ;;  %v1300_v63 = vmul.f32 0.020408163, %v841_v59 }
 0x1d6   : > { %1558 = vst.msk [vmem:[%s1921_s15 + $0x4d8] sm:$0xff] %vm1402_vm1, %v1301_v62  ;;  %1557 = vst.msk [vmem:[%s1921_s15 + $0x4d0] sm:$0xff] %vm1402_vm1, %v1300_v63  ;;  %1059 = vadd.xlane.f32.xlu1 %v1058_v60  ;;  %1056 = vadd.xlane.f32.xlu0 %v1055_v61  ;;  %v1106_v60 = vsel %vm376_vm0, %v363_v56, 0.0  ;;  %v1103_v61 = vsel %vm376_vm0, %v362_v57, 0.0 }
 0x1d7   : > { %v850_v2 = vpop.xlane.xlu1 %849  ;;  %v847_v3 = vpop.xlane.xlu0 %846 }
 0x1d8   : > { %v1303_v6 = vmul.f32 0.020408163, %v850_v2  ;;  %v1302_v7 = vmul.f32 0.020408163, %v847_v3 }
 0x1da   : > { %1560 = vst.msk [vmem:[%s1921_s15 + $0x4e8] sm:$0xff] %vm1402_vm1, %v1303_v6  ;;  %1559 = vst.msk [vmem:[%s1921_s15 + $0x4e0] sm:$0xff] %vm1402_vm1, %v1302_v7  ;;  %1065 = vadd.xlane.f32.xlu1 %v1064_v4  ;;  %1062 = vadd.xlane.f32.xlu0 %v1061_v5  ;;  %v1112_v4 = vsel %vm376_vm0, %v365_v0, 0.0  ;;  %v1109_v5 = vsel %vm376_vm0, %v364_v1, 0.0 }
 0x1db   : > { %v856_v10 = vpop.xlane.xlu1 %855  ;;  %v853_v11 = vpop.xlane.xlu0 %852 }
 0x1dc   : > { %v1305_v14 = vmul.f32 0.020408163, %v856_v10  ;;  %v1304_v15 = vmul.f32 0.020408163, %v853_v11 }
 0x1de   : > { %1562 = vst.msk [vmem:[%s1921_s15 + $0x4f8] sm:$0xff] %vm1402_vm1, %v1305_v14  ;;  %1561 = vst.msk [vmem:[%s1921_s15 + $0x4f0] sm:$0xff] %vm1402_vm1, %v1304_v15  ;;  %1071 = vadd.xlane.f32.xlu1 %v1070_v12  ;;  %1068 = vadd.xlane.f32.xlu0 %v1067_v13  ;;  %v1118_v12 = vsel %vm376_vm0, %v367_v8, 0.0  ;;  %v1115_v13 = vsel %vm376_vm0, %v366_v9, 0.0 }
 0x1df   : > { %v862_v18 = vpop.xlane.xlu1 %861  ;;  %v859_v19 = vpop.xlane.xlu0 %858 }
 0x1e0   : > { %v1307_v22 = vmul.f32 0.020408163, %v862_v18  ;;  %v1306_v23 = vmul.f32 0.020408163, %v859_v19 }
 0x1e2   : > { %1564 = vst.msk [vmem:[%s1921_s15 + $0x508] sm:$0xff] %vm1402_vm1, %v1307_v22  ;;  %1563 = vst.msk [vmem:[%s1921_s15 + $0x500] sm:$0xff] %vm1402_vm1, %v1306_v23  ;;  %1077 = vadd.xlane.f32.xlu1 %v1076_v20  ;;  %1074 = vadd.xlane.f32.xlu0 %v1073_v21  ;;  %v1124_v20 = vsel %vm376_vm0, %v369_v16, 0.0  ;;  %v1121_v21 = vsel %vm376_vm0, %v368_v17, 0.0 }
 0x1e3   : > { %v868_v26 = vpop.xlane.xlu1 %867  ;;  %v865_v27 = vpop.xlane.xlu0 %864 }
 0x1e4   : > { %v1309_v30 = vmul.f32 0.020408163, %v868_v26  ;;  %v1308_v31 = vmul.f32 0.020408163, %v865_v27 }
 0x1e6   : > { %1566 = vst.msk [vmem:[%s1921_s15 + $0x518] sm:$0xff] %vm1402_vm1, %v1309_v30  ;;  %1565 = vst.msk [vmem:[%s1921_s15 + $0x510] sm:$0xff] %vm1402_vm1, %v1308_v31  ;;  %1083 = vadd.xlane.f32.xlu1 %v1082_v28  ;;  %1080 = vadd.xlane.f32.xlu0 %v1079_v29  ;;  %v1130_v28 = vsel %vm376_vm0, %v371_v24, 0.0  ;;  %v1127_v29 = vsel %vm376_vm0, %v370_v25, 0.0 }
 0x1e7   : > { %v874_v34 = vpop.xlane.xlu1 %873  ;;  %v871_v35 = vpop.xlane.xlu0 %870 }
 0x1e8   : > { %v1311_v38 = vmul.f32 0.020408163, %v874_v34  ;;  %v1310_v39 = vmul.f32 0.020408163, %v871_v35 }
 0x1ea   : > { %1568 = vst.msk [vmem:[%s1921_s15 + $0x528] sm:$0xff] %vm1402_vm1, %v1311_v38  ;;  %1567 = vst.msk [vmem:[%s1921_s15 + $0x520] sm:$0xff] %vm1402_vm1, %v1310_v39  ;;  %1089 = vadd.xlane.f32.xlu1 %v1088_v36  ;;  %1086 = vadd.xlane.f32.xlu0 %v1085_v37  ;;  %v1136_v36 = vsel %vm376_vm0, %v373_v32, 0.0  ;;  %v1133_v37 = vsel %vm376_vm0, %v372_v33, 0.0 }
 0x1eb   : > { %v880_v42 = vpop.xlane.xlu1 %879  ;;  %v877_v43 = vpop.xlane.xlu0 %876 }
 0x1ec   : > { %v1313_v46 = vmul.f32 0.020408163, %v880_v42  ;;  %v1312_v47 = vmul.f32 0.020408163, %v877_v43 }
 0x1ee   : > { %1570 = vst.msk [vmem:[%s1921_s15 + $0x538] sm:$0xff] %vm1402_vm1, %v1313_v46  ;;  %1569 = vst.msk [vmem:[%s1921_s15 + $0x530] sm:$0xff] %vm1402_vm1, %v1312_v47  ;;  %1095 = vadd.xlane.f32.xlu1 %v1094_v44  ;;  %1092 = vadd.xlane.f32.xlu0 %v1091_v45  ;;  %v1142_v44 = vsel %vm376_vm0, %v375_v40, 0.0  ;;  %v1139_v45 = vsel %vm376_vm0, %v374_v41, 0.0 }
 0x1ef   : > { %v886_v50 = vpop.xlane.xlu1 %885  ;;  %v883_v51 = vpop.xlane.xlu0 %882 }
 0x1f0   : > { %v1315_v54 = vmul.f32 0.020408163, %v886_v50  ;;  %v1314_v55 = vmul.f32 0.020408163, %v883_v51 }
 0x1f2   : > { %1572 = vst.msk [vmem:[%s1921_s15 + $0x548] sm:$0xff] %vm1402_vm1, %v1315_v54  ;;  %1571 = vst.msk [vmem:[%s1921_s15 + $0x540] sm:$0xff] %vm1402_vm1, %v1314_v55  ;;  %1101 = vadd.xlane.f32.xlu1 %v1100_v52  ;;  %1098 = vadd.xlane.f32.xlu0 %v1097_v53 }
 0x1f3   : > { %v892_v58 = vpop.xlane.xlu1 %891  ;;  %v889_v59 = vpop.xlane.xlu0 %888 }
 0x1f4   : > { %v1317_v62 = vmul.f32 0.020408163, %v892_v58  ;;  %v1316_v63 = vmul.f32 0.020408163, %v889_v59 }
 0x1f6   : > { %1574 = vst.msk [vmem:[%s1921_s15 + $0x558] sm:$0xff] %vm1402_vm1, %v1317_v62  ;;  %1573 = vst.msk [vmem:[%s1921_s15 + $0x550] sm:$0xff] %vm1402_vm1, %v1316_v63  ;;  %1107 = vadd.xlane.f32.xlu1 %v1106_v60  ;;  %1104 = vadd.xlane.f32.xlu0 %v1103_v61 }
 0x1f7   : > { %v898_v2 = vpop.xlane.xlu1 %897  ;;  %v895_v3 = vpop.xlane.xlu0 %894 }
 0x1f8   : > { %v1319_v6 = vmul.f32 0.020408163, %v898_v2  ;;  %v1318_v7 = vmul.f32 0.020408163, %v895_v3 }
 0x1fa   : > { %1576 = vst.msk [vmem:[%s1921_s15 + $0x568] sm:$0xff] %vm1402_vm1, %v1319_v6  ;;  %1575 = vst.msk [vmem:[%s1921_s15 + $0x560] sm:$0xff] %vm1402_vm1, %v1318_v7  ;;  %1113 = vadd.xlane.f32.xlu1 %v1112_v4  ;;  %1110 = vadd.xlane.f32.xlu0 %v1109_v5 }
 0x1fb   : > { %v904_v10 = vpop.xlane.xlu1 %903  ;;  %v901_v11 = vpop.xlane.xlu0 %900 }
 0x1fc   : > { %v1321_v14 = vmul.f32 0.020408163, %v904_v10  ;;  %v1320_v15 = vmul.f32 0.020408163, %v901_v11 }
 0x1fe   : > { %1578 = vst.msk [vmem:[%s1921_s15 + $0x578] sm:$0xff] %vm1402_vm1, %v1321_v14  ;;  %1577 = vst.msk [vmem:[%s1921_s15 + $0x570] sm:$0xff] %vm1402_vm1, %v1320_v15  ;;  %1119 = vadd.xlane.f32.xlu1 %v1118_v12  ;;  %1116 = vadd.xlane.f32.xlu0 %v1115_v13 }
 0x1ff   : > { %v910_v18 = vpop.xlane.xlu1 %909  ;;  %v907_v19 = vpop.xlane.xlu0 %906 }
 0x200   : > { %v1323_v22 = vmul.f32 0.020408163, %v910_v18  ;;  %v1322_v23 = vmul.f32 0.020408163, %v907_v19 }
 0x202   : > { %1580 = vst.msk [vmem:[%s1921_s15 + $0x588] sm:$0xff] %vm1402_vm1, %v1323_v22  ;;  %1579 = vst.msk [vmem:[%s1921_s15 + $0x580] sm:$0xff] %vm1402_vm1, %v1322_v23  ;;  %1125 = vadd.xlane.f32.xlu1 %v1124_v20  ;;  %1122 = vadd.xlane.f32.xlu0 %v1121_v21 }
 0x203   : > { %v916_v26 = vpop.xlane.xlu1 %915  ;;  %v913_v27 = vpop.xlane.xlu0 %912 }
 0x204   : > { %v1325_v30 = vmul.f32 0.020408163, %v916_v26  ;;  %v1324_v31 = vmul.f32 0.020408163, %v913_v27 }
 0x206   : > { %1582 = vst.msk [vmem:[%s1921_s15 + $0x598] sm:$0xff] %vm1402_vm1, %v1325_v30  ;;  %1581 = vst.msk [vmem:[%s1921_s15 + $0x590] sm:$0xff] %vm1402_vm1, %v1324_v31  ;;  %1131 = vadd.xlane.f32.xlu1 %v1130_v28  ;;  %1128 = vadd.xlane.f32.xlu0 %v1127_v29 }
 0x207   : > { %v922_v34 = vpop.xlane.xlu1 %921  ;;  %v919_v35 = vpop.xlane.xlu0 %918 }
 0x208   : > { %v1327_v38 = vmul.f32 0.020408163, %v922_v34  ;;  %v1326_v39 = vmul.f32 0.020408163, %v919_v35 }
 0x20a   : > { %1584 = vst.msk [vmem:[%s1921_s15 + $0x5a8] sm:$0xff] %vm1402_vm1, %v1327_v38  ;;  %1583 = vst.msk [vmem:[%s1921_s15 + $0x5a0] sm:$0xff] %vm1402_vm1, %v1326_v39  ;;  %1137 = vadd.xlane.f32.xlu1 %v1136_v36  ;;  %1134 = vadd.xlane.f32.xlu0 %v1133_v37 }
 0x20b   : > { %v928_v42 = vpop.xlane.xlu1 %927  ;;  %v925_v43 = vpop.xlane.xlu0 %924 }
 0x20c   : > { %v1329_v46 = vmul.f32 0.020408163, %v928_v42  ;;  %v1328_v47 = vmul.f32 0.020408163, %v925_v43 }
 0x20e   : > { %1586 = vst.msk [vmem:[%s1921_s15 + $0x5b8] sm:$0xff] %vm1402_vm1, %v1329_v46  ;;  %1585 = vst.msk [vmem:[%s1921_s15 + $0x5b0] sm:$0xff] %vm1402_vm1, %v1328_v47  ;;  %1143 = vadd.xlane.f32.xlu1 %v1142_v44  ;;  %1140 = vadd.xlane.f32.xlu0 %v1139_v45 }
 0x20f   : > { %v934_v48 = vpop.xlane.xlu1 %933  ;;  %v931_v49 = vpop.xlane.xlu0 %930 }
 0x210   : > { %v1331_v50 = vmul.f32 0.020408163, %v934_v48  ;;  %v1330_v51 = vmul.f32 0.020408163, %v931_v49 }
 0x212   : > { %1588 = vst.msk [vmem:[%s1921_s15 + $0x5c8] sm:$0xff] %vm1402_vm1, %v1331_v50  ;;  %1587 = vst.msk [vmem:[%s1921_s15 + $0x5c0] sm:$0xff] %vm1402_vm1, %v1330_v51 }
 0x213   : > { %v940_v52 = vpop.xlane.xlu1 %939  ;;  %v937_v53 = vpop.xlane.xlu0 %936 }
 0x214   : > { %v1333_v54 = vmul.f32 0.020408163, %v940_v52  ;;  %v1332_v55 = vmul.f32 0.020408163, %v937_v53 }
 0x216   : > { %1590 = vst.msk [vmem:[%s1921_s15 + $0x5d8] sm:$0xff] %vm1402_vm1, %v1333_v54  ;;  %1589 = vst.msk [vmem:[%s1921_s15 + $0x5d0] sm:$0xff] %vm1402_vm1, %v1332_v55 }
 0x217   : > { %v946_v56 = vpop.xlane.xlu1 %945  ;;  %v943_v57 = vpop.xlane.xlu0 %942 }
 0x218   : > { %v1335_v58 = vmul.f32 0.020408163, %v946_v56  ;;  %v1334_v59 = vmul.f32 0.020408163, %v943_v57 }
 0x21a   : > { %1592 = vst.msk [vmem:[%s1921_s15 + $0x5e8] sm:$0xff] %vm1402_vm1, %v1335_v58  ;;  %1591 = vst.msk [vmem:[%s1921_s15 + $0x5e0] sm:$0xff] %vm1402_vm1, %v1334_v59 }
 0x21b   : > { %v952_v60 = vpop.xlane.xlu1 %951  ;;  %v949_v61 = vpop.xlane.xlu0 %948 }
 0x21c   : > { %v1337_v62 = vmul.f32 0.020408163, %v952_v60  ;;  %v1336_v63 = vmul.f32 0.020408163, %v949_v61 }
 0x21e   : > { %1594 = vst.msk [vmem:[%s1921_s15 + $0x5f8] sm:$0xff] %vm1402_vm1, %v1337_v62  ;;  %1593 = vst.msk [vmem:[%s1921_s15 + $0x5f0] sm:$0xff] %vm1402_vm1, %v1336_v63 }
 0x21f   : > { %v958_v0 = vpop.xlane.xlu1 %957  ;;  %v955_v1 = vpop.xlane.xlu0 %954 }
 0x220   : > { %v1339_v2 = vmul.f32 0.020408163, %v958_v0  ;;  %v1338_v3 = vmul.f32 0.020408163, %v955_v1 }
 0x222   : > { %1596 = vst.msk [vmem:[%s1921_s15 + $0x608] sm:$0xff] %vm1402_vm1, %v1339_v2  ;;  %1595 = vst.msk [vmem:[%s1921_s15 + $0x600] sm:$0xff] %vm1402_vm1, %v1338_v3 }
 0x223   : > { %v964_v4 = vpop.xlane.xlu1 %963  ;;  %v961_v5 = vpop.xlane.xlu0 %960 }
 0x224   : > { %v1341_v6 = vmul.f32 0.020408163, %v964_v4  ;;  %v1340_v7 = vmul.f32 0.020408163, %v961_v5 }
 0x226   : > { %1598 = vst.msk [vmem:[%s1921_s15 + $0x618] sm:$0xff] %vm1402_vm1, %v1341_v6  ;;  %1597 = vst.msk [vmem:[%s1921_s15 + $0x610] sm:$0xff] %vm1402_vm1, %v1340_v7 }
 0x227   : > { %v970_v8 = vpop.xlane.xlu1 %969  ;;  %v967_v9 = vpop.xlane.xlu0 %966 }
 0x228   : > { %v1343_v10 = vmul.f32 0.020408163, %v970_v8  ;;  %v1342_v11 = vmul.f32 0.020408163, %v967_v9 }
 0x22a   : > { %1600 = vst.msk [vmem:[%s1921_s15 + $0x628] sm:$0xff] %vm1402_vm1, %v1343_v10  ;;  %1599 = vst.msk [vmem:[%s1921_s15 + $0x620] sm:$0xff] %vm1402_vm1, %v1342_v11 }
 0x22b   : > { %v976_v12 = vpop.xlane.xlu1 %975  ;;  %v973_v13 = vpop.xlane.xlu0 %972 }
 0x22c   : > { %v1345_v14 = vmul.f32 0.020408163, %v976_v12  ;;  %v1344_v15 = vmul.f32 0.020408163, %v973_v13 }
 0x22e   : > { %1602 = vst.msk [vmem:[%s1921_s15 + $0x638] sm:$0xff] %vm1402_vm1, %v1345_v14  ;;  %1601 = vst.msk [vmem:[%s1921_s15 + $0x630] sm:$0xff] %vm1402_vm1, %v1344_v15 }
 0x22f   : > { %v982_v16 = vpop.xlane.xlu1 %981  ;;  %v979_v17 = vpop.xlane.xlu0 %978 }
 0x230   : > { %v1347_v18 = vmul.f32 0.020408163, %v982_v16  ;;  %v1346_v19 = vmul.f32 0.020408163, %v979_v17 }
 0x232   : > { %1604 = vst.msk [vmem:[%s1921_s15 + $0x648] sm:$0xff] %vm1402_vm1, %v1347_v18  ;;  %1603 = vst.msk [vmem:[%s1921_s15 + $0x640] sm:$0xff] %vm1402_vm1, %v1346_v19 }
 0x233   : > { %v988_v20 = vpop.xlane.xlu1 %987  ;;  %v985_v21 = vpop.xlane.xlu0 %984 }
 0x234   : > { %v1349_v22 = vmul.f32 0.020408163, %v988_v20  ;;  %v1348_v23 = vmul.f32 0.020408163, %v985_v21 }
 0x236   : > { %1606 = vst.msk [vmem:[%s1921_s15 + $0x658] sm:$0xff] %vm1402_vm1, %v1349_v22  ;;  %1605 = vst.msk [vmem:[%s1921_s15 + $0x650] sm:$0xff] %vm1402_vm1, %v1348_v23 }
 0x237   : > { %v994_v24 = vpop.xlane.xlu1 %993  ;;  %v991_v25 = vpop.xlane.xlu0 %990 }
 0x238   : > { %v1351_v26 = vmul.f32 0.020408163, %v994_v24  ;;  %v1350_v27 = vmul.f32 0.020408163, %v991_v25 }
 0x23a   : > { %1608 = vst.msk [vmem:[%s1921_s15 + $0x668] sm:$0xff] %vm1402_vm1, %v1351_v26  ;;  %1607 = vst.msk [vmem:[%s1921_s15 + $0x660] sm:$0xff] %vm1402_vm1, %v1350_v27 }
 0x23b   : > { %v1000_v28 = vpop.xlane.xlu1 %999  ;;  %v997_v29 = vpop.xlane.xlu0 %996 }
 0x23c   : > { %v1353_v30 = vmul.f32 0.020408163, %v1000_v28  ;;  %v1352_v31 = vmul.f32 0.020408163, %v997_v29 }
 0x23e   : > { %1610 = vst.msk [vmem:[%s1921_s15 + $0x678] sm:$0xff] %vm1402_vm1, %v1353_v30  ;;  %1609 = vst.msk [vmem:[%s1921_s15 + $0x670] sm:$0xff] %vm1402_vm1, %v1352_v31 }
 0x23f   : > { %v1006_v32 = vpop.xlane.xlu1 %1005  ;;  %v1003_v33 = vpop.xlane.xlu0 %1002 }
 0x240   : > { %v1355_v34 = vmul.f32 0.020408163, %v1006_v32  ;;  %v1354_v35 = vmul.f32 0.020408163, %v1003_v33 }
 0x242   : > { %1612 = vst.msk [vmem:[%s1921_s15 + $0x688] sm:$0xff] %vm1402_vm1, %v1355_v34  ;;  %1611 = vst.msk [vmem:[%s1921_s15 + $0x680] sm:$0xff] %vm1402_vm1, %v1354_v35 }
 0x243   : > { %v1012_v36 = vpop.xlane.xlu1 %1011  ;;  %v1009_v37 = vpop.xlane.xlu0 %1008 }
 0x244   : > { %v1357_v38 = vmul.f32 0.020408163, %v1012_v36  ;;  %v1356_v39 = vmul.f32 0.020408163, %v1009_v37 }
 0x246   : > { %1614 = vst.msk [vmem:[%s1921_s15 + $0x698] sm:$0xff] %vm1402_vm1, %v1357_v38  ;;  %1613 = vst.msk [vmem:[%s1921_s15 + $0x690] sm:$0xff] %vm1402_vm1, %v1356_v39 }
 0x247   : > { %v1018_v40 = vpop.xlane.xlu1 %1017  ;;  %v1015_v41 = vpop.xlane.xlu0 %1014 }
 0x248   : > { %v1359_v42 = vmul.f32 0.020408163, %v1018_v40  ;;  %v1358_v43 = vmul.f32 0.020408163, %v1015_v41 }
 0x24a   : > { %1616 = vst.msk [vmem:[%s1921_s15 + $0x6a8] sm:$0xff] %vm1402_vm1, %v1359_v42  ;;  %1615 = vst.msk [vmem:[%s1921_s15 + $0x6a0] sm:$0xff] %vm1402_vm1, %v1358_v43 }
 0x24b   : > { %v1024_v44 = vpop.xlane.xlu1 %1023  ;;  %v1021_v45 = vpop.xlane.xlu0 %1020 }
 0x24c   : > { %v1361_v46 = vmul.f32 0.020408163, %v1024_v44  ;;  %v1360_v47 = vmul.f32 0.020408163, %v1021_v45 }
 0x24e   : > { %1618 = vst.msk [vmem:[%s1921_s15 + $0x6b8] sm:$0xff] %vm1402_vm1, %v1361_v46  ;;  %1617 = vst.msk [vmem:[%s1921_s15 + $0x6b0] sm:$0xff] %vm1402_vm1, %v1360_v47 }
 0x24f   : > { %v1030_v48 = vpop.xlane.xlu1 %1029  ;;  %v1027_v49 = vpop.xlane.xlu0 %1026 }
 0x250   : > { %v1363_v50 = vmul.f32 0.020408163, %v1030_v48  ;;  %v1362_v51 = vmul.f32 0.020408163, %v1027_v49 }
 0x252   : > { %1620 = vst.msk [vmem:[%s1921_s15 + $0x6c8] sm:$0xff] %vm1402_vm1, %v1363_v50  ;;  %1619 = vst.msk [vmem:[%s1921_s15 + $0x6c0] sm:$0xff] %vm1402_vm1, %v1362_v51 }
 0x253   : > { %v1036_v52 = vpop.xlane.xlu1 %1035  ;;  %v1033_v53 = vpop.xlane.xlu0 %1032 }
 0x254   : > { %v1365_v54 = vmul.f32 0.020408163, %v1036_v52  ;;  %v1364_v55 = vmul.f32 0.020408163, %v1033_v53 }
 0x256   : > { %1622 = vst.msk [vmem:[%s1921_s15 + $0x6d8] sm:$0xff] %vm1402_vm1, %v1365_v54  ;;  %1621 = vst.msk [vmem:[%s1921_s15 + $0x6d0] sm:$0xff] %vm1402_vm1, %v1364_v55 }
 0x257   : > { %v1042_v56 = vpop.xlane.xlu1 %1041  ;;  %v1039_v57 = vpop.xlane.xlu0 %1038 }
 0x258   : > { %v1367_v58 = vmul.f32 0.020408163, %v1042_v56  ;;  %v1366_v59 = vmul.f32 0.020408163, %v1039_v57 }
 0x25a   : > { %1624 = vst.msk [vmem:[%s1921_s15 + $0x6e8] sm:$0xff] %vm1402_vm1, %v1367_v58  ;;  %1623 = vst.msk [vmem:[%s1921_s15 + $0x6e0] sm:$0xff] %vm1402_vm1, %v1366_v59 }
 0x25b   : > { %v1048_v60 = vpop.xlane.xlu1 %1047  ;;  %v1045_v61 = vpop.xlane.xlu0 %1044 }
 0x25c   : > { %v1369_v62 = vmul.f32 0.020408163, %v1048_v60  ;;  %v1368_v63 = vmul.f32 0.020408163, %v1045_v61 }
 0x25e   : > { %1626 = vst.msk [vmem:[%s1921_s15 + $0x6f8] sm:$0xff] %vm1402_vm1, %v1369_v62  ;;  %1625 = vst.msk [vmem:[%s1921_s15 + $0x6f0] sm:$0xff] %vm1402_vm1, %v1368_v63 }
 0x25f   : > { %v1054_v0 = vpop.xlane.xlu1 %1053  ;;  %v1051_v1 = vpop.xlane.xlu0 %1050 }
 0x260   : > { %v1371_v2 = vmul.f32 0.020408163, %v1054_v0  ;;  %v1370_v3 = vmul.f32 0.020408163, %v1051_v1 }
 0x262   : > { %1628 = vst.msk [vmem:[%s1921_s15 + $0x708] sm:$0xff] %vm1402_vm1, %v1371_v2  ;;  %1627 = vst.msk [vmem:[%s1921_s15 + $0x700] sm:$0xff] %vm1402_vm1, %v1370_v3 }
 0x263   : > { %v1060_v4 = vpop.xlane.xlu1 %1059  ;;  %v1057_v5 = vpop.xlane.xlu0 %1056 }
 0x264   : > { %v1373_v6 = vmul.f32 0.020408163, %v1060_v4  ;;  %v1372_v7 = vmul.f32 0.020408163, %v1057_v5 }
 0x266   : > { %1630 = vst.msk [vmem:[%s1921_s15 + $0x718] sm:$0xff] %vm1402_vm1, %v1373_v6  ;;  %1629 = vst.msk [vmem:[%s1921_s15 + $0x710] sm:$0xff] %vm1402_vm1, %v1372_v7 }
 0x267   : > { %v1066_v8 = vpop.xlane.xlu1 %1065  ;;  %v1063_v9 = vpop.xlane.xlu0 %1062 }
 0x268   : > { %v1375_v10 = vmul.f32 0.020408163, %v1066_v8  ;;  %v1374_v11 = vmul.f32 0.020408163, %v1063_v9 }
 0x26a   : > { %1632 = vst.msk [vmem:[%s1921_s15 + $0x728] sm:$0xff] %vm1402_vm1, %v1375_v10  ;;  %1631 = vst.msk [vmem:[%s1921_s15 + $0x720] sm:$0xff] %vm1402_vm1, %v1374_v11 }
 0x26b   : > { %v1072_v12 = vpop.xlane.xlu1 %1071  ;;  %v1069_v13 = vpop.xlane.xlu0 %1068 }
 0x26c   : > { %v1377_v14 = vmul.f32 0.020408163, %v1072_v12  ;;  %v1376_v15 = vmul.f32 0.020408163, %v1069_v13 }
 0x26e   : > { %1634 = vst.msk [vmem:[%s1921_s15 + $0x738] sm:$0xff] %vm1402_vm1, %v1377_v14  ;;  %1633 = vst.msk [vmem:[%s1921_s15 + $0x730] sm:$0xff] %vm1402_vm1, %v1376_v15 }
 0x26f   : > { %v1078_v16 = vpop.xlane.xlu1 %1077  ;;  %v1075_v17 = vpop.xlane.xlu0 %1074 }
 0x270   : > { %v1379_v18 = vmul.f32 0.020408163, %v1078_v16  ;;  %v1378_v19 = vmul.f32 0.020408163, %v1075_v17 }
 0x272   : > { %1636 = vst.msk [vmem:[%s1921_s15 + $0x748] sm:$0xff] %vm1402_vm1, %v1379_v18  ;;  %1635 = vst.msk [vmem:[%s1921_s15 + $0x740] sm:$0xff] %vm1402_vm1, %v1378_v19 }
 0x273   : > { %v1084_v20 = vpop.xlane.xlu1 %1083  ;;  %v1081_v21 = vpop.xlane.xlu0 %1080 }
 0x274   : > { %v1381_v22 = vmul.f32 0.020408163, %v1084_v20  ;;  %v1380_v23 = vmul.f32 0.020408163, %v1081_v21 }
 0x276   : > { %1638 = vst.msk [vmem:[%s1921_s15 + $0x758] sm:$0xff] %vm1402_vm1, %v1381_v22  ;;  %1637 = vst.msk [vmem:[%s1921_s15 + $0x750] sm:$0xff] %vm1402_vm1, %v1380_v23 }
 0x277   : > { %v1090_v24 = vpop.xlane.xlu1 %1089  ;;  %v1087_v25 = vpop.xlane.xlu0 %1086 }
 0x278   : > { %v1383_v26 = vmul.f32 0.020408163, %v1090_v24  ;;  %v1382_v27 = vmul.f32 0.020408163, %v1087_v25 }
 0x27a   : > { %1640 = vst.msk [vmem:[%s1921_s15 + $0x768] sm:$0xff] %vm1402_vm1, %v1383_v26  ;;  %1639 = vst.msk [vmem:[%s1921_s15 + $0x760] sm:$0xff] %vm1402_vm1, %v1382_v27 }
 0x27b   : > { %v1096_v28 = vpop.xlane.xlu1 %1095  ;;  %v1093_v29 = vpop.xlane.xlu0 %1092 }
 0x27c   : > { %v1385_v30 = vmul.f32 0.020408163, %v1096_v28  ;;  %v1384_v31 = vmul.f32 0.020408163, %v1093_v29 }
 0x27e   : > { %1642 = vst.msk [vmem:[%s1921_s15 + $0x778] sm:$0xff] %vm1402_vm1, %v1385_v30  ;;  %1641 = vst.msk [vmem:[%s1921_s15 + $0x770] sm:$0xff] %vm1402_vm1, %v1384_v31 }
 0x27f   : > { %v1102_v32 = vpop.xlane.xlu1 %1101  ;;  %v1099_v33 = vpop.xlane.xlu0 %1098 }
 0x280   : > { %v1387_v34 = vmul.f32 0.020408163, %v1102_v32  ;;  %v1386_v35 = vmul.f32 0.020408163, %v1099_v33 }
 0x282   : > { %1644 = vst.msk [vmem:[%s1921_s15 + $0x788] sm:$0xff] %vm1402_vm1, %v1387_v34  ;;  %1643 = vst.msk [vmem:[%s1921_s15 + $0x780] sm:$0xff] %vm1402_vm1, %v1386_v35 }
 0x283   : > { %v1108_v36 = vpop.xlane.xlu1 %1107  ;;  %v1105_v37 = vpop.xlane.xlu0 %1104 }
 0x284   : > { %v1389_v38 = vmul.f32 0.020408163, %v1108_v36  ;;  %v1388_v39 = vmul.f32 0.020408163, %v1105_v37 }
 0x286   : > { %1646 = vst.msk [vmem:[%s1921_s15 + $0x798] sm:$0xff] %vm1402_vm1, %v1389_v38  ;;  %1645 = vst.msk [vmem:[%s1921_s15 + $0x790] sm:$0xff] %vm1402_vm1, %v1388_v39 }
 0x287   : > { %v1114_v40 = vpop.xlane.xlu1 %1113  ;;  %v1111_v41 = vpop.xlane.xlu0 %1110 }
 0x288   : > { %v1391_v42 = vmul.f32 0.020408163, %v1114_v40  ;;  %v1390_v43 = vmul.f32 0.020408163, %v1111_v41 }
 0x28a   : > { %1648 = vst.msk [vmem:[%s1921_s15 + $0x7a8] sm:$0xff] %vm1402_vm1, %v1391_v42  ;;  %1647 = vst.msk [vmem:[%s1921_s15 + $0x7a0] sm:$0xff] %vm1402_vm1, %v1390_v43 }
 0x28b   : > { %v1120_v44 = vpop.xlane.xlu1 %1119  ;;  %v1117_v45 = vpop.xlane.xlu0 %1116 }
 0x28c   : > { %v1393_v46 = vmul.f32 0.020408163, %v1120_v44  ;;  %v1392_v47 = vmul.f32 0.020408163, %v1117_v45 }
 0x28e   : > { %1650 = vst.msk [vmem:[%s1921_s15 + $0x7b8] sm:$0xff] %vm1402_vm1, %v1393_v46  ;;  %1649 = vst.msk [vmem:[%s1921_s15 + $0x7b0] sm:$0xff] %vm1402_vm1, %v1392_v47 }
 0x28f   : > { %v1126_v48 = vpop.xlane.xlu1 %1125  ;;  %v1123_v49 = vpop.xlane.xlu0 %1122 }
 0x290   : > { %v1395_v50 = vmul.f32 0.020408163, %v1126_v48  ;;  %v1394_v51 = vmul.f32 0.020408163, %v1123_v49 }
 0x292   : > { %1652 = vst.msk [vmem:[%s1921_s15 + $0x7c8] sm:$0xff] %vm1402_vm1, %v1395_v50  ;;  %1651 = vst.msk [vmem:[%s1921_s15 + $0x7c0] sm:$0xff] %vm1402_vm1, %v1394_v51 }
 0x293   : > { %v1132_v52 = vpop.xlane.xlu1 %1131  ;;  %v1129_v53 = vpop.xlane.xlu0 %1128 }
 0x294   : > { %v1397_v54 = vmul.f32 0.020408163, %v1132_v52  ;;  %v1396_v55 = vmul.f32 0.020408163, %v1129_v53 }
 0x296   : > { %1654 = vst.msk [vmem:[%s1921_s15 + $0x7d8] sm:$0xff] %vm1402_vm1, %v1397_v54  ;;  %1653 = vst.msk [vmem:[%s1921_s15 + $0x7d0] sm:$0xff] %vm1402_vm1, %v1396_v55 }
 0x297   : > { %v1138_v56 = vpop.xlane.xlu1 %1137  ;;  %v1135_v57 = vpop.xlane.xlu0 %1134 }
 0x298   : > { %v1399_v58 = vmul.f32 0.020408163, %v1138_v56  ;;  %v1398_v59 = vmul.f32 0.020408163, %v1135_v57 }
 0x29a   : > { %1656 = vst.msk [vmem:[%s1921_s15 + $0x7e8] sm:$0xff] %vm1402_vm1, %v1399_v58  ;;  %1655 = vst.msk [vmem:[%s1921_s15 + $0x7e0] sm:$0xff] %vm1402_vm1, %v1398_v59 }
 0x29b   : > { %v1144_v60 = vpop.xlane.xlu1 %1143  ;;  %v1141_v61 = vpop.xlane.xlu0 %1140 }
 0x29c   : > { %v1401_v62 = vmul.f32 0.020408163, %v1144_v60  ;;  %v1400_v63 = vmul.f32 0.020408163, %v1141_v61 }
 0x29e   : > { %1658 = vst.msk [vmem:[%s1921_s15 + $0x7f8] sm:$0xff] %vm1402_vm1, %v1401_v62  ;;  %1657 = vst.msk [vmem:[%s1921_s15 + $0x7f0] sm:$0xff] %vm1402_vm1, %v1400_v63 }
 0x29f PF: > { %s11_s6 = sadd.s32 1, %s1740_s6  }
 0x2a0   : > { %p8_p4 = scmp.ge.s32.totalorder %s11_s6, 4  }
 0x2a2   :  { %10 = sbr.rel (!%p8_p4) target bundleno = 1 (0x1), region = 54 }

</bundles_post_ra>
